<compile_context>
chip_gen: v7x
topology: tpu7x:2x2x1
jax: 0.10.0
libtpu: 0.0.40
codegen_flags: <defaults>
</compile_context>

<pallas_src>
import functools
import warnings

import jax
import jax.numpy as jnp
from jax.experimental import pallas as pl
from jax.experimental.pallas import tpu as pltpu


def _residual_upsample_kernel(x_ref, xp_ref, xn_ref, wfb_ref, wb_ref, wy_ref,
                              wc_ref, wr_ref, wrc_ref, w2_ref, a_ref, o_ref,
                              *, C, W, tile_rows):
    Cout = C // 2
    P = tile_rows * W          # pixels in this row-tile (flattened, row-major)
    a1 = a_ref[0]              # PReLU #1 slope (scalar, SMEM)
    a2 = a_ref[1]              # PReLU #2 slope

    def prelu(v, a):           # element-wise math stays f32 (v5e has no bf16 VPU)
        return jnp.where(v >= 0, v, a * v)

    def mm(u, w_ref):          # matmul operands in the weight dtype, f32 accumulate
        w = w_ref[...]
        return jnp.dot(u.astype(w.dtype), w, preferred_element_type=jnp.float32)

    # Column-edge masks, built once per tile (hoisted, not re-broadcast).
    col = jax.lax.broadcasted_iota(jnp.int32, (P, 1), 0) % W
    first_col = col == 0
    last_col = col == (W - 1)
    # v[i+1] / v[i-1] inside the flattened tile; wrap-around positions are
    # always edge columns and get fixed by the masks above.
    shift_next = lambda v: pltpu.roll(v, P - 1, 0)
    shift_prev = lambda v: pltpu.roll(v, 1, 0)

    x = x_ref[0]               # (P, C)  current row-tile
    xp = xp_ref[0]             # (W, C)  row above the tile (clamped at row 0)
    xn = xn_ref[0]             # (W, C)  row below the tile (clamped at row H-1)

    is_last_tile = pl.program_id(1) == pl.num_programs(1) - 1
    not_last = 1.0 - is_last_tile.astype(jnp.float32)

    # ---- fused first 1x1 convs: RHS = [w1 | wb] applied to x and to xn ----
    xm = mm(x, wfb_ref)        # (P, C + Cout)
    xnm = mm(xn, wfb_ref)      # (W, C + Cout)
    xb = xm[:, C:]             # bottom-branch 1x1(x)           (P, Cout)
    xb_n = xnm[:, C:]          # bottom-branch 1x1(row below)   (W, Cout)
    xb_p = mm(xp, wb_ref)      # bottom-branch 1x1(row above)   (W, Cout)

    # ---- bottom branch: bilinear x2 (align_corners=False) after the 1x1 ----
    if tile_rows > 1:
        xb_up = jnp.concatenate([xb_p, xb[:P - W, :]], axis=0)   # xb[h-1, w] (clamped)
        xb_dn = jnp.concatenate([xb[W:, :], xb_n], axis=0)       # xb[h+1, w] (clamped)
    else:
        xb_up, xb_dn = xb_p, xb_n
    #   even output index -> 0.25*v[i-1] + 0.75*v[i]
    #   odd  output index -> 0.75*v[i]   + 0.25*v[i+1]     (borders clamped)
    r_e = 0.25 * xb_up + 0.75 * xb
    r_o = 0.75 * xb + 0.25 * xb_dn
    col_prev_clamp = lambda v: jnp.where(first_col, v, shift_prev(v))
    col_next_clamp = lambda v: jnp.where(last_col, v, shift_next(v))
    b_ee = 0.25 * col_prev_clamp(r_e) + 0.75 * r_e
    b_eo = 0.75 * r_e + 0.25 * col_next_clamp(r_e)
    b_oe = 0.25 * col_prev_clamp(r_o) + 0.75 * r_o
    b_oo = 0.75 * r_o + 0.25 * col_next_clamp(r_o)

    # ---- top branch: PReLU, shifted copies, N-stacked deconv taps ----
    y = prelu(xm[:, :C], a1)                       # (P, C)
    y_halo = prelu(xnm[:, :C], a1) * not_last      # (W, C); zero past the image
    if tile_rows > 1:
        y_r = jnp.concatenate([y[W:, :], y_halo], axis=0)        # y[h+1, w]
    else:
        y_r = y_halo
    y_c = jnp.where(last_col, 0.0, shift_next(y))                # y[h, w+1]
    y_rc = jnp.where(last_col, 0.0, shift_next(y_r))             # y[h+1, w+1]

    # One matmul per shifted input; RHS columns blocked as [ee | eo | oe | oo].
    d_y = mm(y, wy_ref)        # (P, 4C)
    d_c = mm(y_c, wc_ref)      # (P, 2C)   [eo | oo]
    d_r = mm(y_r, wr_ref)      # (P, 2C)   [oe | oo]
    d_rc = mm(y_rc, wrc_ref)   # (P, C)    [oo]

    def finish(t):             # PReLU + Conv1x1(C -> Cout)
        return mm(prelu(t, a2), w2_ref)

    o_dtype = o_ref.dtype
    # Even output rows: (col-even, col-odd) lane-packed -> (P, 2*Cout), then a
    # layout-preserving split of the row dim (W % sublane-tile == 0) and a
    # store straight into the interleaved (tile_rows, 2, W, 2*Cout) block.
    p_ee = finish(d_y[:, 0:C]) + b_ee
    p_eo = finish(d_y[:, C:2 * C] + d_c[:, 0:C]) + b_eo
    even = jnp.concatenate([p_ee, p_eo], axis=-1).astype(o_dtype)
    o_ref[0, :, 0, :, :] = even.reshape(tile_rows, W, 2 * Cout)
    # Odd output rows.
    p_oe = finish(d_y[:, 2 * C:3 * C] + d_r[:, 0:C]) + b_oe
    p_oo = finish(d_y[:, 3 * C:4 * C] + d_c[:, C:2 * C] + d_r[:, C:2 * C] + d_rc) + b_oo
    odd = jnp.concatenate([p_oe, p_oo], axis=-1).astype(o_dtype)
    o_ref[0, :, 1, :, :] = odd.reshape(tile_rows, W, 2 * Cout)


def init_params(key, C):
    """Deterministic synthetic parameters with PyTorch-convention shapes.

    The module default is bias=False (and therefore align_corners=False), so
    there are intentionally no bias vectors.
    """
    Cout = C // 2
    k1, k2, k3, k4 = jax.random.split(key, 4)
    conv1_w = jax.random.normal(k1, (C, C, 1, 1), jnp.float32) * 0.3      # Conv2d(C, C, 1)
    deconv_w = jax.random.normal(k2, (C, C, 3, 3), jnp.float32) * 0.2     # ConvTranspose2d (Cin, Cout, kh, kw)
    conv2_w = jax.random.normal(k3, (Cout, C, 1, 1), jnp.float32) * 0.3   # Conv2d(C, C//2, 1)
    convb_w = jax.random.normal(k4, (Cout, C, 1, 1), jnp.float32) * 0.3   # bottom Conv2d(C, C//2, 1)
    a1 = jnp.float32(0.25)   # PReLU default init
    a2 = jnp.float32(0.25)
    return conv1_w, deconv_w, conv2_w, convb_w, a1, a2


def _pack_params(params, matmul_dtype):
    """Repack PyTorch-shaped weights into matmul-ready (fused / N-stacked) RHS."""
    conv1_w, deconv_w, conv2_w, convb_w, a1, a2 = params
    C = conv1_w.shape[0]
    w1 = conv1_w[:, :, 0, 0].T                                    # (C, C)
    wb = convb_w[:, :, 0, 0].T                                    # (C, Cout)
    w2 = conv2_w[:, :, 0, 0].T                                    # (C, Cout)
    wfb = jnp.concatenate([w1, wb], axis=1)                       # fused [w1 | wb]
    wt = jnp.transpose(deconv_w, (2, 3, 0, 1)).reshape(9, C, C)   # idx = kh*3 + kw
    # Deconv taps N-stacked per shifted LHS; columns ordered [ee | eo | oe | oo].
    w_y = jnp.concatenate([wt[4], wt[5], wt[7], wt[8]], axis=1)   # LHS: y
    w_c = jnp.concatenate([wt[3], wt[6]], axis=1)                 # LHS: y[h, w+1]
    w_r = jnp.concatenate([wt[1], wt[2]], axis=1)                 # LHS: y[h+1, w]
    w_rc = wt[0]                                                  # LHS: y[h+1, w+1]
    a = jnp.stack([a1, a2]).astype(jnp.float32)                   # (2,)
    cast = lambda w: w.astype(matmul_dtype)
    return (cast(wfb), cast(wb), cast(w_y), cast(w_c), cast(w_r), cast(w_rc),
            cast(w2), a)


def _vmem_budget(user_budget=None):
    """Generation-aware (tile budget, vmem_limit_bytes)."""
    cap = 64 * 1024 * 1024                       # conservative (v7x-sized) fallback
    try:
        cap = int(pltpu.get_tpu_info().vmem_capacity_bytes)
    except Exception:
        pass
    if cap >= 96 * 1024 * 1024:                  # v5e / v6e: 128 MiB physical VMEM
        budget, limit = 28 * 1024 * 1024, 80 * 1024 * 1024
    else:                                        # v7x: 64 MiB physical VMEM
        budget, limit = 14 * 1024 * 1024, 40 * 1024 * 1024
    return (user_budget if user_budget is not None else budget), limit


def _choose_tile_rows(N, H, W, C, in_isize, out_isize, budget_bytes):
    """Largest row-tile (divisor of H) whose rough per-step VMEM footprint fits,
    capped so the (parallel) grid keeps at least 2 steps (v7x has 2 TCs)."""
    Cout = C // 2

    def footprint(tr):
        P = tr * W
        io_in = 2 * (P + 2 * W) * C * in_isize           # main + halos, double buffered
        io_out = 2 * (2 * P * 2 * Cout) * out_isize      # interleaved slab, double buffered
        live = 4 * P * (14 * C + 12 * Cout)              # f32 intermediates (generous)
        return io_in + io_out + live

    divisors = [d for d in range(1, H + 1) if H % d == 0]
    fitting = [d for d in divisors if footprint(d) <= budget_bytes] or [1]
    tr = max(fitting)
    if N * (H // tr) < 2:                                # keep >= 2 grid steps if cheap
        split = [d for d in fitting if 2 <= H // d <= 8]
        if split:
            tr = max(split)
    if tr == 1 and H > 8:
        warnings.warn("ResidualUpSample Pallas kernel: H=%d has no row-tile divisor "
                      "fitting the VMEM budget; falling back to 1-row tiles (slow). "
                      "Consider padding H." % H)
    return tr


def residual_upsample_nhwc(x_nhwc, params, *, matmul_dtype=jnp.bfloat16,
                           out_dtype=None, tile_rows=None, vmem_tile_budget=None):
    """Fused ResidualUpSample, NHWC in -> NHWC out (the fast path: the wrapper
    only performs free row-major reshapes around the kernel)."""
    N, H, W, C = x_nhwc.shape
    assert C % 2 == 0, "in_channels must be even"
    Cout = C // 2
    out_dtype = x_nhwc.dtype if out_dtype is None else jnp.dtype(out_dtype)
    in_isize = jnp.dtype(x_nhwc.dtype).itemsize
    out_isize = jnp.dtype(out_dtype).itemsize
    assert W % 8 == 0, "W must be a multiple of 8 for the (8,128) block tiling"
    if in_isize == 2 or out_isize == 2:
        assert W % 16 == 0, "16-bit activations need W % 16 == 0 (16-row sublane tiles)"
    # TODO(synk): masked remainder tiles so H need not be divisible by tile_rows.

    budget, vmem_limit = _vmem_budget(vmem_tile_budget)
    if tile_rows is None:
        tile_rows = _choose_tile_rows(N, H, W, C, in_isize, out_isize, budget)
    assert H % tile_rows == 0, (H, tile_rows)
    num_tiles = H // tile_rows
    P = tile_rows * W

    wfb, wb, w_y, w_c, w_r, w_rc, w2, a = _pack_params(params, matmul_dtype)
    x = x_nhwc.reshape(N, H * W, C)          # free row-major merge, no transpose

    kernel = functools.partial(_residual_upsample_kernel, C=C, W=W,
                               tile_rows=tile_rows)

    # Main tile + two one-row halo blocks of the SAME input, with border-clamped
    # index maps (halo block size W along dim 1 => block index == image row).
    _main_map = lambda n, r: (n, r, 0)
    _prev_map = lambda n, r: (n, jnp.maximum(r * tile_rows - 1, 0), 0)
    _next_map = lambda n, r: (n, jnp.minimum((r + 1) * tile_rows, H - 1), 0)
    _wmap = lambda n, r: (0, 0)

    out = pl.pallas_call(
        kernel,
        # Flat byte layout of (N, H, 2, W, 2*Cout) == NHWC (N, 2H, 2W, Cout),
        # so the pixel-shuffle is fused into the kernel's store.
        out_shape=jax.ShapeDtypeStruct((N, H, 2, W, 2 * Cout), out_dtype),
        grid=(N, num_tiles),
        in_specs=[
            pl.BlockSpec((1, P, C), _main_map),          # x tile
            pl.BlockSpec((1, W, C), _prev_map),          # row above (clamped)
            pl.BlockSpec((1, W, C), _next_map),          # row below (clamped)
            pl.BlockSpec((C, C + Cout), _wmap),          # fused [w1 | wb]
            pl.BlockSpec((C, Cout), _wmap),              # wb (top halo row only needs this)
            pl.BlockSpec((C, 4 * C), _wmap),             # deconv taps for y
            pl.BlockSpec((C, 2 * C), _wmap),             # deconv taps for y[h, w+1]
            pl.BlockSpec((C, 2 * C), _wmap),             # deconv taps for y[h+1, w]
            pl.BlockSpec((C, C), _wmap),                 # deconv tap  for y[h+1, w+1]
            pl.BlockSpec((C, Cout), _wmap),              # w2
            pl.BlockSpec(memory_space=pltpu.MemorySpace.SMEM),  # PReLU slopes
        ],
        out_specs=pl.BlockSpec((1, tile_rows, 2, W, 2 * Cout),
                               lambda n, r: (n, r, 0, 0, 0)),
        compiler_params=pltpu.CompilerParams(
            dimension_semantics=("parallel", "parallel"),
            vmem_limit_bytes=vmem_limit),
    )(x, x, x, wfb, wb, w_y, w_c, w_r, w_rc, w2, a)

    # Metadata-only view change (row-major merge of adjacent dims).
    return out.reshape(N, 2 * H, 2 * W, Cout)


def residual_upsample(x_nchw, params, **kwargs):
    """NCHW drop-in wrapper matching the PyTorch module (adds two transposes;
    use residual_upsample_nhwc directly in an NHWC pipeline to avoid them)."""
    out = residual_upsample_nhwc(jnp.transpose(x_nchw, (0, 2, 3, 1)), params, **kwargs)
    return jnp.transpose(out, (0, 3, 1, 2))


def residual_upsample_reference(x, params):
    """Plain-JAX reference matching the PyTorch module semantics (NCHW)."""
    conv1_w, deconv_w, conv2_w, convb_w, a1, a2 = params
    prelu = lambda v, a: jnp.where(v >= 0, v, a * v)
    hi = jax.lax.Precision.HIGHEST

    # top branch
    y = prelu(jnp.einsum('nchw,oc->nohw', x, conv1_w[:, :, 0, 0], precision=hi), a1)
    kern = jnp.transpose(deconv_w[:, :, ::-1, ::-1], (1, 0, 2, 3))  # (C_out, C_in, 3, 3)
    t = jax.lax.conv_general_dilated(
        y, kern, window_strides=(1, 1), padding=((1, 2), (1, 2)),
        lhs_dilation=(2, 2), dimension_numbers=('NCHW', 'OIHW', 'NCHW'),
        precision=hi)
    t = prelu(t, a2)
    top = jnp.einsum('nchw,oc->nohw', t, conv2_w[:, :, 0, 0], precision=hi)

    # bottom branch: bilinear x2, align_corners=False (PyTorch semantics)
    def up1d(v, axis):
        L = v.shape[axis]
        src = (jnp.arange(2 * L, dtype=jnp.float32) + 0.5) / 2.0 - 0.5
        src = jnp.maximum(src, 0.0)
        i0 = jnp.floor(src).astype(jnp.int32)
        i1 = jnp.minimum(i0 + 1, L - 1)
        lam = src - i0.astype(jnp.float32)
        shape = [1] * v.ndim
        shape[axis] = 2 * L
        lam = lam.reshape(shape)
        return (1.0 - lam) * jnp.take(v, i0, axis=axis) + lam * jnp.take(v, i1, axis=axis)

    bx = up1d(up1d(x, 2), 3)
    bot = jnp.einsum('nchw,oc->nohw', bx, convb_w[:, :, 0, 0], precision=hi)
    return top + bot


if __name__ == "__main__":
    N, C, H, W = 2, 4, 16, 16
    key = jax.random.PRNGKey(0)
    kx, kp = jax.random.split(key)
    x = jax.random.normal(kx, (N, C, H, W), jnp.float32)
    params = init_params(kp, C)

    ref = residual_upsample_reference(x, params)

    # 1) f32 MXU operands, explicit 4-row tiles: exercises halo / first-tile /
    #    last-tile edge logic through the NCHW-compatible wrapper.
    out = jax.block_until_ready(
        residual_upsample(x, params, matmul_dtype=jnp.float32, tile_rows=4))
    assert out.shape == (N, C // 2, 2 * H, 2 * W), out.shape
    err = float(jnp.max(jnp.abs(out - ref)))
    assert err < 2e-4, f"f32 max abs error vs reference: {err}"

    # 2) Defaults (bf16 MXU operands, f32 activations, auto tile) on the NHWC
    #    fast path; only bf16 operand-rounding error remains.
    x_nhwc = jnp.transpose(x, (0, 2, 3, 1))
    ref_nhwc = jnp.transpose(ref, (0, 2, 3, 1))
    out_nhwc = jax.block_until_ready(residual_upsample_nhwc(x_nhwc, params))
    assert out_nhwc.shape == ref_nhwc.shape, out_nhwc.shape
    err_bf16 = float(jnp.max(jnp.abs(out_nhwc - ref_nhwc)))
    assert err_bf16 < 5e-2, f"bf16-matmul max abs error vs reference: {err_bf16}"

    # 3) bf16 activations in AND out (halved HBM streams), compared against the
    #    f32 reference evaluated on the same bf16-rounded input.
    x_bf16 = x_nhwc.astype(jnp.bfloat16)
    ref_b = residual_upsample_reference(
        jnp.transpose(x_bf16.astype(jnp.float32), (0, 3, 1, 2)), params)
    ref_b_nhwc = jnp.transpose(ref_b, (0, 2, 3, 1))
    out_b = jax.block_until_ready(residual_upsample_nhwc(x_bf16, params, tile_rows=8))
    assert out_b.dtype == jnp.bfloat16, out_b.dtype
    err_b = float(jnp.max(jnp.abs(out_b.astype(jnp.float32) - ref_b_nhwc)))
    assert err_b < 6e-2, f"bf16-activation path max abs error: {err_b}"

    print("KERNEL_OK")
</pallas_src>

<mosaic_0001>
module attributes {stable_mosaic.version = 11 : i64} {
  func.func @_residual_upsample_kernel(%arg0: i32, %arg1: i32, %arg2: memref<1x64x4xf32, #tpu.memory_space<vmem>>, %arg3: memref<1x16x4xf32, #tpu.memory_space<vmem>>, %arg4: memref<1x16x4xf32, #tpu.memory_space<vmem>>, %arg5: memref<4x6xf32, #tpu.memory_space<vmem>>, %arg6: memref<4x2xf32, #tpu.memory_space<vmem>>, %arg7: memref<4x16xf32, #tpu.memory_space<vmem>>, %arg8: memref<4x8xf32, #tpu.memory_space<vmem>>, %arg9: memref<4x8xf32, #tpu.memory_space<vmem>>, %arg10: memref<4x4xf32, #tpu.memory_space<vmem>>, %arg11: memref<4x2xf32, #tpu.memory_space<vmem>>, %arg12: memref<2xf32, #tpu.memory_space<smem>>, %arg13: memref<1x4x2x16x4xf32, #tpu.memory_space<vmem>>) attributes {dimension_semantics = [#tpu.dimension_semantics<parallel>, #tpu.dimension_semantics<parallel>], iteration_bounds = array<i64: 2, 4>, scalar_prefetch = 0 : i64, scratch_operands = 0 : i64, tpu.core_type = #tpu.core_type<tc>, window_params = [{transform_indices = @transform_0, window_bounds = array<i64: 1, 64, 4>}, {transform_indices = @transform_1, window_bounds = array<i64: 1, 16, 4>}, {transform_indices = @transform_2, window_bounds = array<i64: 1, 16, 4>}, {pipeline_mode = #tpu.pipeline_mode<synchronous>, transform_indices = @transform_3, window_bounds = array<i64: 4, 6>}, {pipeline_mode = #tpu.pipeline_mode<synchronous>, transform_indices = @transform_4, window_bounds = array<i64: 4, 2>}, {pipeline_mode = #tpu.pipeline_mode<synchronous>, transform_indices = @transform_5, window_bounds = array<i64: 4, 16>}, {pipeline_mode = #tpu.pipeline_mode<synchronous>, transform_indices = @transform_6, window_bounds = array<i64: 4, 8>}, {pipeline_mode = #tpu.pipeline_mode<synchronous>, transform_indices = @transform_7, window_bounds = array<i64: 4, 8>}, {pipeline_mode = #tpu.pipeline_mode<synchronous>, transform_indices = @transform_8, window_bounds = array<i64: 4, 4>}, {pipeline_mode = #tpu.pipeline_mode<synchronous>, transform_indices = @transform_9, window_bounds = array<i64: 4, 2>}, {transform_indices = @transform_10, window_bounds = array<i64: 2>}, {transform_indices = @transform_11, window_bounds = array<i64: 1, 4, 2, 16, 4>}]} {
    %c0 = arith.constant 0 : index
    %0 = memref.load %arg12[%c0] : memref<2xf32, #tpu.memory_space<smem>>
    %c1 = arith.constant 1 : index
    %1 = memref.load %arg12[%c1] : memref<2xf32, #tpu.memory_space<smem>>
    %2 = tpu.iota {dimensions = array<i32: 0>} : vector<64x1xi32>
    %c16_i32 = arith.constant 16 : i32
    %c0_i32 = arith.constant 0 : i32
    %3 = arith.cmpi eq, %c16_i32, %c0_i32 : i32
    %c1_i32 = arith.constant 1 : i32
    %4 = arith.select %3, %c1_i32, %c16_i32 : i32
    %5 = vector.broadcast %4 : i32 to vector<64x1xi32>
    %6 = arith.remsi %2, %5 : vector<64x1xi32>
    %c0_i32_0 = arith.constant 0 : i32
    %7 = vector.broadcast %c0_i32_0 : i32 to vector<64x1xi32>
    %8 = arith.cmpi ne, %6, %7 : vector<64x1xi32>
    %c0_i32_1 = arith.constant 0 : i32
    %9 = vector.broadcast %c0_i32_1 : i32 to vector<64x1xi32>
    %10 = arith.cmpi slt, %6, %9 : vector<64x1xi32>
    %c0_i32_2 = arith.constant 0 : i32
    %11 = arith.cmpi slt, %4, %c0_i32_2 : i32
    %12 = vector.broadcast %11 : i1 to vector<64x1xi1>
    %13 = vector.broadcast %12 : vector<64x1xi1> to vector<64x1xi1>
    %14 = arith.xori %10, %13 : vector<64x1xi1>
    %15 = arith.andi %14, %8 : vector<64x1xi1>
    %16 = vector.broadcast %4 : i32 to vector<64x1xi32>
    %17 = arith.addi %6, %16 : vector<64x1xi32>
    %18 = arith.select %15, %17, %6 : vector<64x1xi1>, vector<64x1xi32>
    %c0_i32_3 = arith.constant 0 : i32
    %19 = vector.broadcast %c0_i32_3 : i32 to vector<64x1xi32>
    %20 = arith.cmpi eq, %18, %19 : vector<64x1xi32>
    %c15_i32 = arith.constant 15 : i32
    %21 = vector.broadcast %c15_i32 : i32 to vector<64x1xi32>
    %22 = arith.cmpi eq, %18, %21 : vector<64x1xi32>
    %c0_4 = arith.constant 0 : index
    %c0_5 = arith.constant 0 : index
    %c0_6 = arith.constant 0 : index
    %23 = vector.load %arg2[%c0_4, %c0_5, %c0_6] : memref<1x64x4xf32, #tpu.memory_space<vmem>>, vector<1x64x4xf32>
    %24 = vector.shape_cast %23 : vector<1x64x4xf32> to vector<64x4xf32>
    %c0_7 = arith.constant 0 : index
    %c0_8 = arith.constant 0 : index
    %c0_9 = arith.constant 0 : index
    %25 = vector.load %arg3[%c0_7, %c0_8, %c0_9] : memref<1x16x4xf32, #tpu.memory_space<vmem>>, vector<1x16x4xf32>
    %26 = vector.shape_cast %25 : vector<1x16x4xf32> to vector<16x4xf32>
    %c0_10 = arith.constant 0 : index
    %c0_11 = arith.constant 0 : index
    %c0_12 = arith.constant 0 : index
    %27 = vector.load %arg4[%c0_10, %c0_11, %c0_12] : memref<1x16x4xf32, #tpu.memory_space<vmem>>, vector<1x16x4xf32>
    %28 = vector.shape_cast %27 : vector<1x16x4xf32> to vector<16x4xf32>
    %c3_i32 = arith.constant 3 : i32
    %29 = arith.cmpi eq, %arg1, %c3_i32 : i32
    %30 = arith.extui %29 : i1 to i32
    %31 = arith.sitofp %30 : i32 to f32
    %cst = arith.constant 1.000000e+00 : f32
    %32 = arith.subf %cst, %31 : f32
    %c0_13 = arith.constant 0 : index
    %c0_14 = arith.constant 0 : index
    %33 = vector.load %arg5[%c0_13, %c0_14] : memref<4x6xf32, #tpu.memory_space<vmem>>, vector<4x6xf32>
    %cst_15 = arith.constant dense<0.000000e+00> : vector<64x6xf32>
    %34 = tpu.matmul %24, %33, %cst_15 {dimension_numbers = #tpu.dot_dimension_numbers<[1], [0], [0], [1], [0, 0, 1, 1], [], []>} : vector<64x4xf32>, vector<4x6xf32>, vector<64x6xf32> -> vector<64x6xf32>
    %c0_16 = arith.constant 0 : index
    %c0_17 = arith.constant 0 : index
    %35 = vector.load %arg5[%c0_16, %c0_17] : memref<4x6xf32, #tpu.memory_space<vmem>>, vector<4x6xf32>
    %cst_18 = arith.constant dense<0.000000e+00> : vector<16x6xf32>
    %36 = tpu.matmul %28, %35, %cst_18 {dimension_numbers = #tpu.dot_dimension_numbers<[1], [0], [0], [1], [0, 0, 1, 1], [], []>} : vector<16x4xf32>, vector<4x6xf32>, vector<16x6xf32> -> vector<16x6xf32>
    %37 = vector.extract_strided_slice %34 {offsets = [0, 4], sizes = [64, 2], strides = [1, 1]} : vector<64x6xf32> to vector<64x2xf32>
    %38 = vector.extract_strided_slice %36 {offsets = [0, 4], sizes = [16, 2], strides = [1, 1]} : vector<16x6xf32> to vector<16x2xf32>
    %c0_19 = arith.constant 0 : index
    %c0_20 = arith.constant 0 : index
    %39 = vector.load %arg6[%c0_19, %c0_20] : memref<4x2xf32, #tpu.memory_space<vmem>>, vector<4x2xf32>
    %cst_21 = arith.constant dense<0.000000e+00> : vector<16x2xf32>
    %40 = tpu.matmul %26, %39, %cst_21 {dimension_numbers = #tpu.dot_dimension_numbers<[1], [0], [0], [1], [0, 0, 1, 1], [], []>} : vector<16x4xf32>, vector<4x2xf32>, vector<16x2xf32> -> vector<16x2xf32>
    %41 = vector.extract_strided_slice %37 {offsets = [0, 0], sizes = [48, 2], strides = [1, 1]} : vector<64x2xf32> to vector<48x2xf32>
    %42 = tpu.concatenate %40, %41 in 0 : vector<16x2xf32>, vector<48x2xf32> -> vector<64x2xf32>
    %43 = vector.extract_strided_slice %37 {offsets = [16, 0], sizes = [48, 2], strides = [1, 1]} : vector<64x2xf32> to vector<48x2xf32>
    %44 = tpu.concatenate %43, %38 in 0 : vector<48x2xf32>, vector<16x2xf32> -> vector<64x2xf32>
    %cst_22 = arith.constant 2.500000e-01 : f32
    %45 = vector.broadcast %cst_22 : f32 to vector<64x2xf32>
    %46 = arith.mulf %45, %42 : vector<64x2xf32>
    %cst_23 = arith.constant 7.500000e-01 : f32
    %47 = vector.broadcast %cst_23 : f32 to vector<64x2xf32>
    %48 = arith.mulf %47, %37 : vector<64x2xf32>
    %49 = arith.addf %46, %48 : vector<64x2xf32>
    %cst_24 = arith.constant 7.500000e-01 : f32
    %50 = vector.broadcast %cst_24 : f32 to vector<64x2xf32>
    %51 = arith.mulf %50, %37 : vector<64x2xf32>
    %cst_25 = arith.constant 2.500000e-01 : f32
    %52 = vector.broadcast %cst_25 : f32 to vector<64x2xf32>
    %53 = arith.mulf %52, %44 : vector<64x2xf32>
    %54 = arith.addf %51, %53 : vector<64x2xf32>
    %c1_i32_26 = arith.constant 1 : i32
    %55 = tpu.dynamic_rotate %49 by %c1_i32_26 dim 0 : vector<64x2xf32>, i32 -> vector<64x2xf32>
    %56 = vector.shape_cast %20 : vector<64x1xi1> to vector<64x1xi1>
    %57 = vector.broadcast %56 : vector<64x1xi1> to vector<64x2xi1>
    %58 = arith.select %57, %49, %55 : vector<64x2xi1>, vector<64x2xf32>
    %cst_27 = arith.constant 2.500000e-01 : f32
    %59 = vector.broadcast %cst_27 : f32 to vector<64x2xf32>
    %60 = arith.mulf %59, %58 : vector<64x2xf32>
    %cst_28 = arith.constant 7.500000e-01 : f32
    %61 = vector.broadcast %cst_28 : f32 to vector<64x2xf32>
    %62 = arith.mulf %61, %49 : vector<64x2xf32>
    %63 = arith.addf %60, %62 : vector<64x2xf32>
    %cst_29 = arith.constant 7.500000e-01 : f32
    %64 = vector.broadcast %cst_29 : f32 to vector<64x2xf32>
    %65 = arith.mulf %64, %49 : vector<64x2xf32>
    %c63_i32 = arith.constant 63 : i32
    %66 = tpu.dynamic_rotate %49 by %c63_i32 dim 0 : vector<64x2xf32>, i32 -> vector<64x2xf32>
    %67 = vector.shape_cast %22 : vector<64x1xi1> to vector<64x1xi1>
    %68 = vector.broadcast %67 : vector<64x1xi1> to vector<64x2xi1>
    %69 = arith.select %68, %49, %66 : vector<64x2xi1>, vector<64x2xf32>
    %cst_30 = arith.constant 2.500000e-01 : f32
    %70 = vector.broadcast %cst_30 : f32 to vector<64x2xf32>
    %71 = arith.mulf %70, %69 : vector<64x2xf32>
    %72 = arith.addf %65, %71 : vector<64x2xf32>
    %c1_i32_31 = arith.constant 1 : i32
    %73 = tpu.dynamic_rotate %54 by %c1_i32_31 dim 0 : vector<64x2xf32>, i32 -> vector<64x2xf32>
    %74 = vector.shape_cast %20 : vector<64x1xi1> to vector<64x1xi1>
    %75 = vector.broadcast %74 : vector<64x1xi1> to vector<64x2xi1>
    %76 = arith.select %75, %54, %73 : vector<64x2xi1>, vector<64x2xf32>
    %cst_32 = arith.constant 2.500000e-01 : f32
    %77 = vector.broadcast %cst_32 : f32 to vector<64x2xf32>
    %78 = arith.mulf %77, %76 : vector<64x2xf32>
    %cst_33 = arith.constant 7.500000e-01 : f32
    %79 = vector.broadcast %cst_33 : f32 to vector<64x2xf32>
    %80 = arith.mulf %79, %54 : vector<64x2xf32>
    %81 = arith.addf %78, %80 : vector<64x2xf32>
    %cst_34 = arith.constant 7.500000e-01 : f32
    %82 = vector.broadcast %cst_34 : f32 to vector<64x2xf32>
    %83 = arith.mulf %82, %54 : vector<64x2xf32>
    %c63_i32_35 = arith.constant 63 : i32
    %84 = tpu.dynamic_rotate %54 by %c63_i32_35 dim 0 : vector<64x2xf32>, i32 -> vector<64x2xf32>
    %85 = vector.shape_cast %22 : vector<64x1xi1> to vector<64x1xi1>
    %86 = vector.broadcast %85 : vector<64x1xi1> to vector<64x2xi1>
    %87 = arith.select %86, %54, %84 : vector<64x2xi1>, vector<64x2xf32>
    %cst_36 = arith.constant 2.500000e-01 : f32
    %88 = vector.broadcast %cst_36 : f32 to vector<64x2xf32>
    %89 = arith.mulf %88, %87 : vector<64x2xf32>
    %90 = arith.addf %83, %89 : vector<64x2xf32>
    %91 = vector.extract_strided_slice %34 {offsets = [0, 0], sizes = [64, 4], strides = [1, 1]} : vector<64x6xf32> to vector<64x4xf32>
    %cst_37 = arith.constant 0.000000e+00 : f32
    %92 = vector.broadcast %cst_37 : f32 to vector<64x4xf32>
    %93 = arith.cmpf oge, %91, %92 : vector<64x4xf32>
    %94 = vector.broadcast %0 : f32 to vector<64x4xf32>
    %95 = arith.mulf %94, %91 : vector<64x4xf32>
    %96 = arith.select %93, %91, %95 : vector<64x4xi1>, vector<64x4xf32>
    %97 = vector.extract_strided_slice %36 {offsets = [0, 0], sizes = [16, 4], strides = [1, 1]} : vector<16x6xf32> to vector<16x4xf32>
    %cst_38 = arith.constant 0.000000e+00 : f32
    %98 = vector.broadcast %cst_38 : f32 to vector<16x4xf32>
    %99 = arith.cmpf oge, %97, %98 : vector<16x4xf32>
    %100 = vector.broadcast %0 : f32 to vector<16x4xf32>
    %101 = arith.mulf %100, %97 : vector<16x4xf32>
    %102 = arith.select %99, %97, %101 : vector<16x4xi1>, vector<16x4xf32>
    %103 = vector.broadcast %32 : f32 to vector<16x4xf32>
    %104 = arith.mulf %102, %103 : vector<16x4xf32>
    %105 = vector.extract_strided_slice %96 {offsets = [16, 0], sizes = [48, 4], strides = [1, 1]} : vector<64x4xf32> to vector<48x4xf32>
    %106 = tpu.concatenate %105, %104 in 0 : vector<48x4xf32>, vector<16x4xf32> -> vector<64x4xf32>
    %c63_i32_39 = arith.constant 63 : i32
    %107 = tpu.dynamic_rotate %96 by %c63_i32_39 dim 0 : vector<64x4xf32>, i32 -> vector<64x4xf32>
    %cst_40 = arith.constant 0.000000e+00 : f32
    %108 = vector.shape_cast %22 : vector<64x1xi1> to vector<64x1xi1>
    %109 = vector.broadcast %108 : vector<64x1xi1> to vector<64x4xi1>
    %110 = vector.broadcast %cst_40 : f32 to vector<64x4xf32>
    %111 = arith.select %109, %110, %107 : vector<64x4xi1>, vector<64x4xf32>
    %c63_i32_41 = arith.constant 63 : i32
    %112 = tpu.dynamic_rotate %106 by %c63_i32_41 dim 0 : vector<64x4xf32>, i32 -> vector<64x4xf32>
    %cst_42 = arith.constant 0.000000e+00 : f32
    %113 = vector.shape_cast %22 : vector<64x1xi1> to vector<64x1xi1>
    %114 = vector.broadcast %113 : vector<64x1xi1> to vector<64x4xi1>
    %115 = vector.broadcast %cst_42 : f32 to vector<64x4xf32>
    %116 = arith.select %114, %115, %112 : vector<64x4xi1>, vector<64x4xf32>
    %c0_43 = arith.constant 0 : index
    %c0_44 = arith.constant 0 : index
    %117 = vector.load %arg7[%c0_43, %c0_44] : memref<4x16xf32, #tpu.memory_space<vmem>>, vector<4x16xf32>
    %cst_45 = arith.constant dense<0.000000e+00> : vector<64x16xf32>
    %118 = tpu.matmul %96, %117, %cst_45 {dimension_numbers = #tpu.dot_dimension_numbers<[1], [0], [0], [1], [0, 0, 1, 1], [], []>} : vector<64x4xf32>, vector<4x16xf32>, vector<64x16xf32> -> vector<64x16xf32>
    %c0_46 = arith.constant 0 : index
    %c0_47 = arith.constant 0 : index
    %119 = vector.load %arg8[%c0_46, %c0_47] : memref<4x8xf32, #tpu.memory_space<vmem>>, vector<4x8xf32>
    %cst_48 = arith.constant dense<0.000000e+00> : vector<64x8xf32>
    %120 = tpu.matmul %111, %119, %cst_48 {dimension_numbers = #tpu.dot_dimension_numbers<[1], [0], [0], [1], [0, 0, 1, 1], [], []>} : vector<64x4xf32>, vector<4x8xf32>, vector<64x8xf32> -> vector<64x8xf32>
    %c0_49 = arith.constant 0 : index
    %c0_50 = arith.constant 0 : index
    %121 = vector.load %arg9[%c0_49, %c0_50] : memref<4x8xf32, #tpu.memory_space<vmem>>, vector<4x8xf32>
    %cst_51 = arith.constant dense<0.000000e+00> : vector<64x8xf32>
    %122 = tpu.matmul %106, %121, %cst_51 {dimension_numbers = #tpu.dot_dimension_numbers<[1], [0], [0], [1], [0, 0, 1, 1], [], []>} : vector<64x4xf32>, vector<4x8xf32>, vector<64x8xf32> -> vector<64x8xf32>
    %c0_52 = arith.constant 0 : index
    %c0_53 = arith.constant 0 : index
    %123 = vector.load %arg10[%c0_52, %c0_53] : memref<4x4xf32, #tpu.memory_space<vmem>>, vector<4x4xf32>
    %cst_54 = arith.constant dense<0.000000e+00> : vector<64x4xf32>
    %124 = tpu.matmul %116, %123, %cst_54 {dimension_numbers = #tpu.dot_dimension_numbers<[1], [0], [0], [1], [0, 0, 1, 1], [], []>} : vector<64x4xf32>, vector<4x4xf32>, vector<64x4xf32> -> vector<64x4xf32>
    %125 = vector.extract_strided_slice %118 {offsets = [0, 0], sizes = [64, 4], strides = [1, 1]} : vector<64x16xf32> to vector<64x4xf32>
    %cst_55 = arith.constant 0.000000e+00 : f32
    %126 = vector.broadcast %cst_55 : f32 to vector<64x4xf32>
    %127 = arith.cmpf oge, %125, %126 : vector<64x4xf32>
    %128 = vector.broadcast %1 : f32 to vector<64x4xf32>
    %129 = arith.mulf %128, %125 : vector<64x4xf32>
    %130 = arith.select %127, %125, %129 : vector<64x4xi1>, vector<64x4xf32>
    %c0_56 = arith.constant 0 : index
    %c0_57 = arith.constant 0 : index
    %131 = vector.load %arg11[%c0_56, %c0_57] : memref<4x2xf32, #tpu.memory_space<vmem>>, vector<4x2xf32>
    %cst_58 = arith.constant dense<0.000000e+00> : vector<64x2xf32>
    %132 = tpu.matmul %130, %131, %cst_58 {dimension_numbers = #tpu.dot_dimension_numbers<[1], [0], [0], [1], [0, 0, 1, 1], [], []>} : vector<64x4xf32>, vector<4x2xf32>, vector<64x2xf32> -> vector<64x2xf32>
    %133 = arith.addf %132, %63 : vector<64x2xf32>
    %134 = vector.extract_strided_slice %118 {offsets = [0, 4], sizes = [64, 4], strides = [1, 1]} : vector<64x16xf32> to vector<64x4xf32>
    %135 = vector.extract_strided_slice %120 {offsets = [0, 0], sizes = [64, 4], strides = [1, 1]} : vector<64x8xf32> to vector<64x4xf32>
    %136 = arith.addf %134, %135 : vector<64x4xf32>
    %cst_59 = arith.constant 0.000000e+00 : f32
    %137 = vector.broadcast %cst_59 : f32 to vector<64x4xf32>
    %138 = arith.cmpf oge, %136, %137 : vector<64x4xf32>
    %139 = vector.broadcast %1 : f32 to vector<64x4xf32>
    %140 = arith.mulf %139, %136 : vector<64x4xf32>
    %141 = arith.select %138, %136, %140 : vector<64x4xi1>, vector<64x4xf32>
    %c0_60 = arith.constant 0 : index
    %c0_61 = arith.constant 0 : index
    %142 = vector.load %arg11[%c0_60, %c0_61] : memref<4x2xf32, #tpu.memory_space<vmem>>, vector<4x2xf32>
    %cst_62 = arith.constant dense<0.000000e+00> : vector<64x2xf32>
    %143 = tpu.matmul %141, %142, %cst_62 {dimension_numbers = #tpu.dot_dimension_numbers<[1], [0], [0], [1], [0, 0, 1, 1], [], []>} : vector<64x4xf32>, vector<4x2xf32>, vector<64x2xf32> -> vector<64x2xf32>
    %144 = arith.addf %143, %72 : vector<64x2xf32>
    %145 = tpu.concatenate %133, %144 in 1 : vector<64x2xf32>, vector<64x2xf32> -> vector<64x4xf32>
    %146 = vector.shape_cast %145 : vector<64x4xf32> to vector<4x16x4xf32>
    %c0_63 = arith.constant 0 : index
    %c0_64 = arith.constant 0 : index
    %c0_65 = arith.constant 0 : index
    %c0_66 = arith.constant 0 : index
    %c0_67 = arith.constant 0 : index
    %147 = vector.load %arg13[%c0_63, %c0_64, %c0_65, %c0_66, %c0_67] : memref<1x4x2x16x4xf32, #tpu.memory_space<vmem>>, vector<1x4x1x16x4xf32>
    %148 = vector.shape_cast %147 : vector<1x4x1x16x4xf32> to vector<4x16x4xf32>
    %149 = vector.shape_cast %146 : vector<4x16x4xf32> to vector<1x4x1x16x4xf32>
    tpu.vector_store %arg13[%c0_63, %c0_64, %c0_65, %c0_66, %c0_67], %149 {strides = array<i32>} : memref<1x4x2x16x4xf32, #tpu.memory_space<vmem>>, vector<1x4x1x16x4xf32>,
    %150 = vector.extract_strided_slice %118 {offsets = [0, 8], sizes = [64, 4], strides = [1, 1]} : vector<64x16xf32> to vector<64x4xf32>
    %151 = vector.extract_strided_slice %122 {offsets = [0, 0], sizes = [64, 4], strides = [1, 1]} : vector<64x8xf32> to vector<64x4xf32>
    %152 = arith.addf %150, %151 : vector<64x4xf32>
    %cst_68 = arith.constant 0.000000e+00 : f32
    %153 = vector.broadcast %cst_68 : f32 to vector<64x4xf32>
    %154 = arith.cmpf oge, %152, %153 : vector<64x4xf32>
    %155 = vector.broadcast %1 : f32 to vector<64x4xf32>
    %156 = arith.mulf %155, %152 : vector<64x4xf32>
    %157 = arith.select %154, %152, %156 : vector<64x4xi1>, vector<64x4xf32>
    %c0_69 = arith.constant 0 : index
    %c0_70 = arith.constant 0 : index
    %158 = vector.load %arg11[%c0_69, %c0_70] : memref<4x2xf32, #tpu.memory_space<vmem>>, vector<4x2xf32>
    %cst_71 = arith.constant dense<0.000000e+00> : vector<64x2xf32>
    %159 = tpu.matmul %157, %158, %cst_71 {dimension_numbers = #tpu.dot_dimension_numbers<[1], [0], [0], [1], [0, 0, 1, 1], [], []>} : vector<64x4xf32>, vector<4x2xf32>, vector<64x2xf32> -> vector<64x2xf32>
    %160 = arith.addf %159, %81 : vector<64x2xf32>
    %161 = vector.extract_strided_slice %118 {offsets = [0, 12], sizes = [64, 4], strides = [1, 1]} : vector<64x16xf32> to vector<64x4xf32>
    %162 = vector.extract_strided_slice %120 {offsets = [0, 4], sizes = [64, 4], strides = [1, 1]} : vector<64x8xf32> to vector<64x4xf32>
    %163 = arith.addf %161, %162 : vector<64x4xf32>
    %164 = vector.extract_strided_slice %122 {offsets = [0, 4], sizes = [64, 4], strides = [1, 1]} : vector<64x8xf32> to vector<64x4xf32>
    %165 = arith.addf %163, %164 : vector<64x4xf32>
    %166 = arith.addf %165, %124 : vector<64x4xf32>
    %cst_72 = arith.constant 0.000000e+00 : f32
    %167 = vector.broadcast %cst_72 : f32 to vector<64x4xf32>
    %168 = arith.cmpf oge, %166, %167 : vector<64x4xf32>
    %169 = vector.broadcast %1 : f32 to vector<64x4xf32>
    %170 = arith.mulf %169, %166 : vector<64x4xf32>
    %171 = arith.select %168, %166, %170 : vector<64x4xi1>, vector<64x4xf32>
    %c0_73 = arith.constant 0 : index
    %c0_74 = arith.constant 0 : index
    %172 = vector.load %arg11[%c0_73, %c0_74] : memref<4x2xf32, #tpu.memory_space<vmem>>, vector<4x2xf32>
    %cst_75 = arith.constant dense<0.000000e+00> : vector<64x2xf32>
    %173 = tpu.matmul %171, %172, %cst_75 {dimension_numbers = #tpu.dot_dimension_numbers<[1], [0], [0], [1], [0, 0, 1, 1], [], []>} : vector<64x4xf32>, vector<4x2xf32>, vector<64x2xf32> -> vector<64x2xf32>
    %174 = arith.addf %173, %90 : vector<64x2xf32>
    %175 = tpu.concatenate %160, %174 in 1 : vector<64x2xf32>, vector<64x2xf32> -> vector<64x4xf32>
    %176 = vector.shape_cast %175 : vector<64x4xf32> to vector<4x16x4xf32>
    %c0_76 = arith.constant 0 : index
    %c0_77 = arith.constant 0 : index
    %c1_78 = arith.constant 1 : index
    %c0_79 = arith.constant 0 : index
    %c0_80 = arith.constant 0 : index
    %177 = vector.load %arg13[%c0_76, %c0_77, %c1_78, %c0_79, %c0_80] : memref<1x4x2x16x4xf32, #tpu.memory_space<vmem>>, vector<1x4x1x16x4xf32>
    %178 = vector.shape_cast %177 : vector<1x4x1x16x4xf32> to vector<4x16x4xf32>
    %179 = vector.shape_cast %176 : vector<4x16x4xf32> to vector<1x4x1x16x4xf32>
    tpu.vector_store %arg13[%c0_76, %c0_77, %c1_78, %c0_79, %c0_80], %179 {strides = array<i32>} : memref<1x4x2x16x4xf32, #tpu.memory_space<vmem>>, vector<1x4x1x16x4xf32>,
    return
  }
  func.func @transform_0(%arg0: i32, %arg1: i32) -> (i32, i32, i32) {
    %c0_i32 = arith.constant 0 : i32
    %c0_i32_0 = arith.constant 0 : i32
    return %arg0, %arg1, %c0_i32 : i32, i32, i32
  }
  func.func @transform_1(%arg0: i32, %arg1: i32) -> (i32, i32, i32) {
    %c4_i32 = arith.constant 4 : i32
    %0 = arith.muli %arg1, %c4_i32 : i32
    %c1_i32 = arith.constant 1 : i32
    %1 = arith.subi %0, %c1_i32 : i32
    %c0_i32 = arith.constant 0 : i32
    %2 = arith.maxsi %1, %c0_i32 : i32
    %c0_i32_0 = arith.constant 0 : i32
    %c0_i32_1 = arith.constant 0 : i32
    return %arg0, %2, %c0_i32_0 : i32, i32, i32
  }
  func.func @transform_2(%arg0: i32, %arg1: i32) -> (i32, i32, i32) {
    %c1_i32 = arith.constant 1 : i32
    %0 = arith.addi %arg1, %c1_i32 : i32
    %c4_i32 = arith.constant 4 : i32
    %1 = arith.muli %0, %c4_i32 : i32
    %c15_i32 = arith.constant 15 : i32
    %2 = arith.minsi %1, %c15_i32 : i32
    %c0_i32 = arith.constant 0 : i32
    %c0_i32_0 = arith.constant 0 : i32
    return %arg0, %2, %c0_i32 : i32, i32, i32
  }
  func.func @transform_3(%arg0: i32, %arg1: i32) -> (i32, i32) {
    %c0_i32 = arith.constant 0 : i32
    %c0_i32_0 = arith.constant 0 : i32
    %c0_i32_1 = arith.constant 0 : i32
    return %c0_i32, %c0_i32_0 : i32, i32
  }
  func.func @transform_4(%arg0: i32, %arg1: i32) -> (i32, i32) {
    %c0_i32 = arith.constant 0 : i32
    %c0_i32_0 = arith.constant 0 : i32
    %c0_i32_1 = arith.constant 0 : i32
    return %c0_i32, %c0_i32_0 : i32, i32
  }
  func.func @transform_5(%arg0: i32, %arg1: i32) -> (i32, i32) {
    %c0_i32 = arith.constant 0 : i32
    %c0_i32_0 = arith.constant 0 : i32
    %c0_i32_1 = arith.constant 0 : i32
    return %c0_i32, %c0_i32_0 : i32, i32
  }
  func.func @transform_6(%arg0: i32, %arg1: i32) -> (i32, i32) {
    %c0_i32 = arith.constant 0 : i32
    %c0_i32_0 = arith.constant 0 : i32
    %c0_i32_1 = arith.constant 0 : i32
    return %c0_i32, %c0_i32_0 : i32, i32
  }
  func.func @transform_7(%arg0: i32, %arg1: i32) -> (i32, i32) {
    %c0_i32 = arith.constant 0 : i32
    %c0_i32_0 = arith.constant 0 : i32
    %c0_i32_1 = arith.constant 0 : i32
    return %c0_i32, %c0_i32_0 : i32, i32
  }
  func.func @transform_8(%arg0: i32, %arg1: i32) -> (i32, i32) {
    %c0_i32 = arith.constant 0 : i32
    %c0_i32_0 = arith.constant 0 : i32
    %c0_i32_1 = arith.constant 0 : i32
    return %c0_i32, %c0_i32_0 : i32, i32
  }
  func.func @transform_9(%arg0: i32, %arg1: i32) -> (i32, i32) {
    %c0_i32 = arith.constant 0 : i32
    %c0_i32_0 = arith.constant 0 : i32
    %c0_i32_1 = arith.constant 0 : i32
    return %c0_i32, %c0_i32_0 : i32, i32
  }
  func.func @transform_10(%arg0: i32, %arg1: i32) -> i32 {
    %c0_i32 = arith.constant 0 : i32
    %c0_i32_0 = arith.constant 0 : i32
    return %c0_i32 : i32
  }
  func.func @transform_11(%arg0: i32, %arg1: i32) -> (i32, i32, i32, i32, i32) {
    %c0_i32 = arith.constant 0 : i32
    %c0_i32_0 = arith.constant 0 : i32
    %c0_i32_1 = arith.constant 0 : i32
    %c0_i32_2 = arith.constant 0 : i32
    return %arg0, %arg1, %c0_i32, %c0_i32_0, %c0_i32_1 : i32, i32, i32, i32, i32
  }
}

</mosaic_0001>

<bundles_post_ra>
// kernel: tpu_custom_call.1
= control target key start
LH: loop header
LB: loop body
LE: loop exit
PB: predicated region body
PF: predicated region fallthrough
CT: control target
= control target key end

     0   :  { %16 = vsyncpa [#allocation3], 0  ;;  %s3675_s17 = smov 0   ;;  %s3677_s18 = smov 0   ;;  %s4807_s0 = inlined_call_operand.vmem [shape: f32[2,256,4], index: 0, kind: input, shape index: {}]   ;;  %s4808_s1 = inlined_call_operand.vmem [shape: f32[2,256,4], index: 1, kind: input, shape index: {}]   ;;  %s4809_s2 = inlined_call_operand.vmem [shape: f32[2,256,4], index: 2, kind: input, shape index: {}]   ;;  %s4810_s3 = inlined_call_operand.vmem [shape: f32[4,6], index: 3, kind: input, shape index: {}]   ;;  %s4811_s4 = inlined_call_operand.vmem [shape: f32[4,2], index: 4, kind: input, shape index: {}]   ;;  %s4812_s5 = inlined_call_operand.vmem [shape: f32[4,16], index: 5, kind: input, shape index: {}]   ;;  %s4813_s6 = inlined_call_operand.vmem [shape: f32[4,8], index: 6, kind: input, shape index: {}]   ;;  %s4814_s7 = inlined_call_operand.vmem [shape: f32[4,8], index: 7, kind: input, shape index: {}]   ;;  %s4815_s8 = inlined_call_operand.vmem [shape: f32[4,4], index: 8, kind: input, shape index: {}]   ;;  %s4816_s9 = inlined_call_operand.vmem [shape: f32[4,2], index: 9, kind: input, shape index: {}]   ;;  %s4817_s10 = inlined_call_operand.vmem [shape: f32[2], index: 10, kind: input, shape index: {}]   ;;  %s4818_s11 = inlined_call_operand.vmem [shape: f32[2,16,2,16,4], index: 11, kind: output, shape index: {}]  }
   0x1   :  { %s3679_s19 = smov 0   ;;  %s3681_s20 = smov 0  }
   0x2   :  { %s3683_s21 = smov 0  }
   0x3 LB: > { %s3132_s22 = sadd.s32 4294967295, %s3605_s21   ;;  %s31_s23 = sadd.s32 1, %s3597_s19  ;;  %s3605_s21 = sphi %s3683_s21, %s22_s21   ;;  %s3601_s20 = sphi %s3681_s20, %s4848_s20   ;;  %s3597_s19 = sphi %s3679_s19, %s4847_s19   ;;  %s3593_s18 = sphi %s3677_s18, %s4846_s18   ;;  %s3589_s17 = sphi %s3675_s17, %s4845_s17  }
   0x4   : > { %p32_p0 = scmp.ge.s32.totalorder %s31_s23, 4  ;;  %s34_s24 = sadd.s32 1, %s3601_s20 }
   0x5   : > { %p3140_p1 = scmp.ge.s32.totalorder %s3605_s21, 1  ;;  %p335_p2 = scmp.lt.s32.totalorder %s3605_s21, 9 }
   0x6   : > { %s4850_s23 = smov (%p32_p0, %s31_s23), 0  ;;  %s4852_s24 = smov (!%p32_p0, %s34_s24), %s3601_s20 }
   0x7   : > { %p3708_p3 = pnand %p3140_p1, %p335_p2  ;;  %p36_p4 = scmp.ge.s32.totalorder %s4852_s24, 2 }
   0x8   : > { %p3712_p5 = scmp.eq.s32.totalorder %s3132_s22, 0  ;;  %s369_s29 = sshll.u32 %s4817_s10, 4  ;;  %s370_s29 = int_to_ptr.vmem [resolvable:$true] %s369_s29 }
   0x9   : > { %p3494_p6 = pneg %p3708_p3  ;;  %s4854_s24 = smov (%p36_p4, %s4852_s24), 0 }
   0xa   : > { %s3548_s30 = scalar_lea.vmem %s370_s29, 16  ;;  %p3556_p12 = scmp.lt.s32.totalorder %s370_s29, %s370_s29 }
   0xb   : > { %p3495_p7 = pnand %p3712_p5, %p3494_p6  ;;  %p3549_p8 = scmp.ne.s32.totalorder %s370_s29, %s3548_s30 }
   0xc   : > { %p3557_p13 = scmp.lt.s32.totalorder %s3548_s30, %s3548_s30 }
   0xd   : > { %p3550_p9 = pneg %p3495_p7 }
   0xe   : > { %p3558_p0 = por %p3557_p13, %p3556_p12 }
   0xf   : > { %p3551_p10 = pnand %p3550_p9, %p3549_p8 }
  0x11   : > { %p3552_p11 = pneg %p3551_p10 }
  0x13   : > { %p3559_p1 = pnand %p3558_p0, %p3552_p11 }
  0x15   : > { %3562 = shalt.err (!%p3559_p1)
}
  0x16   : > { %s3607_s12 = smov [#allocation2]   ;;  %437 = sbr.rel (%p3708_p3) target bundleno = 1176 (0x498), region = 64 }
  0x17   : > { %3497 = dma.vmem_to_smem (!%p3495_p7), %s370_s29, 16, %s3607_s12, [#allocation3]  }
  0x1d   : > { %3584 = dma.done.wait (%p3712_p5), [#allocation3], 16  }
  0x1e   : > { %3586 = vsyncadd (%p3712_p5), [#allocation3], 4294967280 }
  0x1f   : > { %443 = sfence }
  0x20   : > { %v709_v0 = vld [vmem:[%s4810_s3] sm:$0xf]  ;;  %vm735_vm0 = vcmask 1043456   ;;  %s3145_s15 = sshll.u32 %s3589_s17, 3  ;;  %p514_p2 = scmp.lt.s32.totalorder %s3593_s18, 1  ;;  %vm710_vm1 = vcmask 31744   ;;  %v572_v18 = vlaneseq }
  0x21   : > { %3352 = vmatprep.subr.msk.mxu0 %vm735_vm0, %v709_v0  ;;  %3488 = vmatprep.subr.msk.mxu1 %vm735_vm0, %v709_v0  ;;  %p516_p3 = scmp.lt.s32.totalorder %s3145_s15, 31  ;;  %s3739_s16 = sshll.u32 %s3589_s17, 2  ;;  %v925_v11 = vld [vmem:[%s4811_s4] sm:$0xf] }
  0x22   : > { %3353 = vmatpush3.msk.msra.mxu0 %vm735_vm0, %v709_v0  ;;  %s4856_s18 = smov (!%p514_p2, %s3593_s18), 1  ;;  %3489 = vmatpush3.msk.msra.mxu1 %vm735_vm0, %v709_v0  ;;  %s3264_s25 = sadd.s32 4, %s3739_s16  ;;  %v1616_v12 = vld [vmem:[%s4813_s6] sm:$0xf]  ;;  %v3804_v19 = vshrl.u32 %v572_v18, 7 }
  0x23   : > { %s4858_s15 = smov (!%p516_p3, %s3145_s15), 31  ;;  %3366 = vmatprep.subr.msk.mxu1 %vm735_vm0, %v709_v0  ;;  %s3748_s22 = sshll.u32 %s4856_s18, 5  ;;  %3390 = vmatprep.subr.msk.mxu0 %vm735_vm0, %v1616_v12  ;;  %v1483_v15 = vld [vmem:[%s4812_s5] sm:$0xf] }
  0x24   : > { %s519_s26 = sadd.s32 %s3748_s22, %s4858_s15  ;;  %p543_p4 = scmp.lt.s32.totalorder %s3264_s25, 15  ;;  %v1749_v16 = vld [vmem:[%s4814_s7] sm:$0xf]  ;;  %v574_v21 = vadd.s32 8, %v3804_v19  ;;  %vm1179_vm2 = vcmp.lt.s32.totalorder %v3804_v19, 7  ;;  %v576_v32 = vadd.s32 24, %v3804_v19 }
  0x25   : > { %s3147_s27 = sshll.u32 %s519_s26, 3  ;;  %v3799_v17 = vld [vmem:[%s4815_s8] sm:$0xf]  ;;  %p705_p8 = scmp.eq.s32.totalorder %s3589_s17, 3  ;;  %v578_v44 = vadd.s32 40, %v3804_v19  ;;  %v580_v60 = vadd.s32 56, %v3804_v19 }
  0x26   : > { %s521_s30 = scalar_lea.vmem %s4807_s0, %s3147_s27  ;;  %s4860_s25 = smov (!%p543_p4, %s3264_s25), 15  ;;  %v592_v31 = vand.u32 15, %v574_v21  ;;  %v606_v56 = vand.u32 15, %v576_v32 }
  0x27   : > { %v693_v1 = vld [vmem:[%s521_s30] sm:$0xff]  ;;  %v694_v2 = vld [vmem:[%s521_s30 + $0x8] sm:$0xff]  ;;  %v699_v3 = vld [vmem:[%s521_s30 + $0x30] sm:$0xff]  ;;  %s3154_s12 = sshll.u32 %s4860_s25, 1  ;;  %s3149_s27 = sadd.s32 4294967295, %s3739_s16 }
  0x28   : > { %3354 = vmatprep.mubr.msk.f32.mxu0 %vm710_vm1, %v693_v1  ;;  %3363 = vmatprep.mubr.msk.f32.mxu1 %vm710_vm1, %v699_v3  ;;  %v700_v4 = vld [vmem:[%s521_s30 + $0x38] sm:$0xff]  ;;  %v695_v5 = vld [vmem:[%s521_s30 + $0x10] sm:$0xff]  ;;  %p548_p5 = scmp.lt.s32.totalorder %s3154_s12, 31  ;;  %v697_v7 = vld [vmem:[%s521_s30 + $0x20] sm:$0xff]  ;;  %p525_p6 = scmp.gt.s32.totalorder %s3149_s27, 0  ;;  %vm3882_vm9 = vcmp.eq.s32.totalorder %v592_v31, 15 }
  0x29   : > { %3355 = vmatmul.mubr.msk.f32.vlgmr.msra.gmra.mrb[0].mxu0 %vm710_vm1, %v694_v2  ;;  %3364 = vmatmul.mubr.msk.f32.vlgmr.msra.gmra.mrb[0].mxu1 %vm710_vm1, %v700_v4  ;;  %v696_v6 = vld [vmem:[%s521_s30 + $0x18] sm:$0xff]  ;;  %v698_v8 = vld [vmem:[%s521_s30 + $0x28] sm:$0xff]  ;;  %vm3919_vm13 = vcmp.eq.s32.totalorder %v606_v56, 15  ;;  %s3161_s29 = sld [smem:[#allocation2 + $0x1]]  ;;  %s3608_s30 = smov 8  }
  0x2a   : > { %3357 = vmatprep.mubr.msk.f32.mxu0 %vm710_vm1, %v695_v5  ;;  %3367 = vmatpush3.msk.msra.mxu1 %vm735_vm0, %v709_v0  ;;  %s4862_s12 = smov (!%p548_p5, %s3154_s12), 31  ;;  %s4864_s27 = smov (!%p525_p6, %s3149_s27), 0  ;;  %v620_v0 = vand.u32 15, %v578_v44 }
  0x2b   : > { %s551_s13 = sadd.s32 %s3748_s22, %s4862_s12  ;;  %s3150_s28 = sshll.u32 %s4864_s27, 1  ;;  %3371 = vmatprep.subr.msk.mxu1 %vm735_vm0, %v925_v11  ;;  %3391 = vmatpush3.msk.msra.mxu0 %vm735_vm0, %v1616_v12 }
  0x2c   : > { %s3156_s14 = sshll.u32 %s551_s13, 3  ;;  %p530_p7 = scmp.lt.s32.totalorder %s3150_s28, 31  ;;  %3418 = vmatprep.subr.msk.mxu0 %vm735_vm0, %v3799_v17  ;;  %vm3942_vm15 = vcmp.eq.s32.totalorder %v620_v0, 15 }
  0x2d   : > { %3358 = vmatmul.mubr.msk.f32.gmra.mrb[2].mxu0 %vm710_vm1, %v696_v6  ;;  %s553_s25 = scalar_lea.vmem %s4809_s2, %s3156_s14  ;;  %s3611_s12 = smov 124  }
  0x2e   : > { %3360 = vmatprep.mubr.msk.f32.mxu0 %vm710_vm1, %v697_v7  ;;  %v703_v9 = vld [vmem:[%s553_s25] sm:$0xff]  ;;  %v704_v10 = vld [vmem:[%s553_s25 + $0x8] sm:$0xff]  ;;  %s4866_s28 = smov (!%p530_p7, %s3150_s28), 31  ;;  %p562_p9 = scmp.lt.s32.totalorder %s3739_s16, 15 }
  0x2f   : > { %3368 = vmatprep.mubr.msk.f32.mxu1 %vm710_vm1, %v703_v9  ;;  %s533_s14 = sadd.s32 %s3748_s22, %s4866_s28  ;;  %s3609_s22 = smov 4  }
  0x30   : > { %3369 = vmatmul.mubr.msk.f32.vlgmr.msra.gmra.mrb[2].mxu1 %vm710_vm1, %v704_v10  ;;  %s3152_s15 = sshll.u32 %s533_s14, 3  ;;  %s570_s14 = sld [smem:[#allocation2]] }
  0x31   : > { %3361 = vmatmul.mubr.msk.f32.gmra.mrb[4].mxu0 %vm710_vm1, %v698_v8  ;;  %3372 = vmatpush3.msk.msra.mxu1 %vm735_vm0, %v925_v11  ;;  %s535_s27 = scalar_lea.vmem %s4808_s1, %s3152_s15  ;;  %s3610_s28 = smov 12  }
  0x32   : > { %v701_v13 = vld [vmem:[%s535_s27] sm:$0xff]  ;;  %v702_v14 = vld [vmem:[%s535_s27 + $0x8] sm:$0xff]  ;;  %3376 = vmatprep.subr.msk.mxu1 %vm735_vm0, %v1483_v15  ;;  %s3808_s15 = scalar_select %p705_p8, 1, 0 }
  0x33   : > { %3373 = vmatprep.mubr.msk.f32.mxu1 %vm710_vm1, %v701_v13  ;;  %s4868_s16 = smov (!%p562_p9, %s3739_s16), 15  ;;  %s3159_s27 = sshll.u32 %s4856_s18, 6 }
  0x34   : > { %3374 = vmatmul.mubr.msk.f32.vlgmr.msra.gmra.mrb[4].mxu1 %vm710_vm1, %v702_v14  ;;  %s707_s17 = scvt.s32.f32 %s3808_s15  ;;  %s3612_s15 = smov 116  }
  0x35   : > { %3377 = vmatpush3.msk.msra.mxu1 %vm735_vm0, %v1483_v15  ;;  %s3158_s25 = sshll.u32 %s4868_s16, 2 }
  0x36   : > { %3404 = vmatprep.subr.msk.mxu1 %vm735_vm0, %v1749_v16  ;;  %v3806_v20 = vstv %s570_s14  ;;  %s3854_s26 = ssub.f32 1.0, %s707_s17  ;;  %s3613_s17 = smov 120  }
  0x38   : > { %v1443_v58 = vstv %s3854_s26  ;;  %s3614_s26 = smov 2  }
  0xfc   : > { %v3811_v22 = vpop.f32.mrb[0].mxu0  ;;  %v3813_v23 = vpop.f32.mrb[0].mxu1 }
  0xfd   : > { %v1422_v24 = vmul.f32 %v3811_v22, %v3806_v20  ;;  %v3818_v25 = vpop.f32.mrb[1].mxu0  ;;  %v3820_v26 = vpop.f32.mrb[1].mxu1  ;;  %vm1413_vm3 = vcmp.ge.f32.partialorder %v3811_v22, 0.0  ;;  %vm1419_vm4 = vcmp.ge.f32.partialorder %v3813_v23, 0.0  ;;  %v1428_v27 = vmul.f32 %v3813_v23, %v3806_v20 }
  0xfe   : > { %vm1412_vm5 = vcmp.ge.f32.partialorder %v3818_v25, 0.0  ;;  %v1421_v28 = vmul.f32 %v3806_v20, %v3818_v25  ;;  %vm1418_vm6 = vcmp.ge.f32.partialorder %v3820_v26, 0.0  ;;  %v1427_v29 = vmul.f32 %v3806_v20, %v3820_v26 }
  0xff   : > { %v1430_v30 = vsel %vm1413_vm3, %v3811_v22, %v1422_v24  ;;  %v3836_v33 = vsel %vm1419_vm4, %v3813_v23, %v1428_v27 }
 0x100   : > { %v3838_v34 = vpop.f32.mrb[2].mxu0  ;;  %v1429_v35 = vsel %vm1412_vm5, %v3818_v25, %v1421_v28  ;;  %v1447_v36 = vrot.slane %v1430_v30, 1  ;;  %v3842_v37 = vsel %vm1418_vm6, %v3820_v26, %v1427_v29  ;;  %v3845_v38 = vrot.slane %v3836_v33, 1 }
 0x101   : > { %v3847_v39 = vpop.f32.mrb[3].mxu0  ;;  %v1446_v40 = vrot.slane %v1429_v35, 1  ;;  %3378 = vmatprep.mubr.msk.f32.mxu1 %vm710_vm1, %v1429_v35  ;;  %vm1415_vm7 = vcmp.ge.f32.partialorder %v3838_v34, 0.0  ;;  %v1424_v41 = vmul.f32 %v3838_v34, %v3806_v20  ;;  %v1452_v42 = vrot.slane %v3842_v37, 1 }
 0x102   : > { %3379 = vmatmul.mubr.msk.f32.vlgmr.msra.gmra.mrb[6].mxu1 %vm710_vm1, %v1430_v30  ;;  %vm1414_vm8 = vcmp.ge.f32.partialorder %v3847_v39, 0.0  ;;  %v1423_v43 = vmul.f32 %v3806_v20, %v3847_v39 }
 0x103   : > { %v1460_v45 = vsel %vm1179_vm2, %v1446_v40, %v1447_v36  ;;  %v3864_v46 = vsel %vm1415_vm7, %v3838_v34, %v1424_v41  ;;  %3405 = vmatpush3.msk.msra.mxu1 %vm735_vm0, %v1749_v16  ;;  %v3870_v47 = vsel %vm1179_vm2, %v1452_v42, %v3845_v38  ;;  %v3875_v48 = vsel %vm1179_vm2, %v3845_v38, %v1446_v40  ;;  %v3892_v57 = vpop.f32.mrb[2].mxu1  ;;  %v2022_v40 = vld [vmem:[%s4816_s9] sm:$0xf] }
 0x104   : > { %v3877_v49 = vpop.f32.mrb[4].mxu0  ;;  %3392 = vmatprep.mubr.msk.f32.mxu0 %vm710_vm1, %v1460_v45  ;;  %v1431_v50 = vsel %vm1414_vm8, %v3847_v39, %v1423_v43  ;;  %v1449_v51 = vrot.slane %v3864_v46, 1  ;;  %vm1438_vm12 = vcmp.ge.f32.partialorder %v3892_v57, 0.0  ;;  %v1440_v61 = vmul.f32 %v3892_v57, %v3806_v20  ;;  %v3906_v63 = vpop.f32.mrb[3].mxu1  ;;  %3432 = vmatprep.subr.msk.mxu1 %vm735_vm0, %v2022_v40 }
 0x105   : > { %v3886_v53 = vpop.f32.mrb[5].mxu0  ;;  %v1448_v54 = vrot.slane %v1431_v50, 1  ;;  %3381 = vmatprep.mubr.msk.f32.mxu1 %vm710_vm1, %v1431_v50  ;;  %vm1417_vm10 = vcmp.ge.f32.partialorder %v3877_v49, 0.0  ;;  %v1426_v55 = vmul.f32 %v3877_v49, %v3806_v20  ;;  %vm1437_vm14 = vcmp.ge.f32.partialorder %v3906_v63, 0.0 }
 0x106   : > { %3382 = vmatmul.mubr.msk.f32.gmra.mrb[8].mxu1 %vm710_vm1, %v3864_v46  ;;  %vm1416_vm11 = vcmp.ge.f32.partialorder %v3886_v53, 0.0  ;;  %v1425_v59 = vmul.f32 %v3806_v20, %v3886_v53  ;;  %v1442_v5 = vsel %vm1438_vm12, %v3892_v57, %v1440_v61  ;;  %v1439_v10 = vmul.f32 %v3806_v20, %v3906_v63 }
 0x107   : > { %v1459_v62 = vsel %vm1179_vm2, %v1447_v36, %v1448_v54  ;;  %v1434_v3 = vsel %vm1417_vm10, %v3877_v49, %v1426_v55  ;;  %v1458_v4 = vsel %vm1179_vm2, %v1448_v54, %v1449_v51  ;;  %v1445_v9 = vmul.f32 %v1443_v58, %v1442_v5 }
 0x108   : > { %v1433_v1 = vsel %vm1416_vm11, %v3886_v53, %v1425_v59  ;;  %v1463_v2 = vsel %vm3882_vm9, 0.0, %v1459_v62  ;;  %v1451_v7 = vrot.slane %v1434_v3, 1  ;;  %v1441_v14 = vsel %vm1437_vm14, %v3906_v63, %v1439_v10 }
 0x109   : > { %v1450_v6 = vrot.slane %v1433_v1, 1  ;;  %3384 = vmatprep.mubr.msk.f32.mxu1 %vm710_vm1, %v1433_v1  ;;  %3393 = vmatmul.mubr.msk.f32.vlgmr.msra.gmra.mrb[6].mxu0 %vm710_vm1, %v1463_v2  ;;  %v1444_v16 = vmul.f32 %v1443_v58, %v1441_v14  ;;  %v634_v20 = vand.u32 15, %v580_v60  ;;  %v1471_v21 = vrot.slane %v1445_v9, 1 }
 0x10a   : > { %3385 = vmatmul.mubr.msk.f32.gmra.mrb[10].mxu1 %vm710_vm1, %v1434_v3  ;;  %3395 = vmatprep.mubr.msk.f32.mxu0 %vm710_vm1, %v1458_v4  ;;  %v1455_v13 = vsel %vm1179_vm2, %v1451_v7, %v1452_v42  ;;  %v4008_v41 = vstv %s3161_s29  ;;  %s566_s29 = sadd.s32 %s3159_s27, %s3158_s25 }
 0x10b   : > { %3387 = vmatprep.mubr.msk.f32.mxu1 %vm710_vm1, %v3842_v37  ;;  %v1457_v11 = vsel %vm1179_vm2, %v1449_v51, %v1450_v6  ;;  %v1456_v12 = vsel %vm1179_vm2, %v1450_v6, %v1451_v7  ;;  %3419 = vmatpush3.msk.msra.mxu0 %vm735_vm0, %v3799_v17  ;;  %v1470_v17 = vrot.slane %v1444_v16, 1  ;;  %v1474_v24 = vsel %vm1179_vm2, %v1471_v21, %v1448_v54 }
 0x10c   : > { %v1465_v15 = vsel %vm3919_vm13, 0.0, %v1457_v11  ;;  %v1467_v27 = vsel %vm3942_vm15, 0.0, %v1455_v13  ;;  %vm3955_vm3 = vcmp.eq.s32.totalorder %v634_v20, 15  ;;  %v1476_v32 = vsel %vm3882_vm9, 0.0, %v1457_v11  ;;  %3446 = vmatprep.subr.msk.mxu0 %vm735_vm0, %v2022_v40 }
 0x10d   : > { %3396 = vmatmul.mubr.msk.f32.gmra.mrb[8].mxu0 %vm710_vm1, %v1465_v15  ;;  %v1473_v29 = vsel %vm1179_vm2, %v3845_v38, %v1470_v17  ;;  %v1472_v30 = vsel %vm1179_vm2, %v1470_v17, %v1471_v21  ;;  %v1469_v31 = vsel %vm3955_vm3, 0.0, %v3875_v48  ;;  %v1478_v35 = vsel %vm3919_vm13, 0.0, %v1455_v13 }
 0x10e   : > { %3388 = vmatmul.mubr.msk.f32.gmra.mrb[12].mxu1 %vm710_vm1, %v3836_v33  ;;  %3398 = vmatprep.mubr.msk.f32.mxu0 %vm710_vm1, %v1456_v12  ;;  %v1480_v36 = vsel %vm3942_vm15, 0.0, %v1473_v29 }
 0x10f   : > { %3406 = vmatprep.mubr.msk.f32.mxu1 %vm710_vm1, %v1431_v50 }
 0x111   : > { %3399 = vmatmul.mubr.msk.f32.gmra.mrb[10].mxu0 %vm710_vm1, %v1467_v27 }
 0x112   : > { %3407 = vmatmul.mubr.msk.f32.vlgmr.msra.gmra.mrb[14].mxu1 %vm710_vm1, %v3864_v46  ;;  %3401 = vmatprep.mubr.msk.f32.mxu0 %vm710_vm1, %v3870_v47 }
 0x113   : > { %3409 = vmatprep.mubr.msk.f32.mxu1 %vm710_vm1, %v1433_v1  ;;  %3433 = vmatpush3.msk.msra.mxu1 %vm735_vm0, %v2022_v40 }
 0x115   : > { %3402 = vmatmul.mubr.msk.f32.gmra.mrb[12].mxu0 %vm710_vm1, %v1469_v31 }
 0x116   : > { %3410 = vmatmul.mubr.msk.f32.gmra.mrb[16].mxu1 %vm710_vm1, %v1434_v3  ;;  %3420 = vmatprep.mubr.msk.f32.mxu0 %vm710_vm1, %v1458_v4 }
 0x117   : > { %3412 = vmatprep.mubr.msk.f32.mxu1 %vm710_vm1, %v3842_v37  ;;  %v3997_v37 = vpop.f32.mrb[4].mxu1 }
 0x118   : > { %v3999_v38 = vpop.f32.mrb[5].mxu1 }
 0x119   : > { %3421 = vmatmul.mubr.msk.f32.vlgmr.msra.gmra.mrb[14].mxu0 %vm710_vm1, %v1476_v32 }
 0x11a   : > { %3413 = vmatmul.mubr.msk.f32.gmra.mrb[18].mxu1 %vm710_vm1, %v3836_v33  ;;  %3423 = vmatprep.mubr.msk.f32.mxu0 %vm710_vm1, %v1456_v12  ;;  %v1482_v33 = vsel %vm3955_vm3, 0.0, %v1474_v24 }
 0x11b   : > { %3415 = vmatprep.mubr.msk.f32.mxu1 %vm710_vm1, %v1444_v16  ;;  %3447 = vmatpush3.msk.msra.mxu0 %vm735_vm0, %v2022_v40 }
 0x11d   : > { %3424 = vmatmul.mubr.msk.f32.gmra.mrb[16].mxu0 %vm710_vm1, %v1478_v35 }
 0x11e   : > { %3426 = vmatprep.mubr.msk.f32.mxu0 %vm710_vm1, %v3870_v47  ;;  %3416 = vmatmul.mubr.msk.f32.gmra.mrb[20].mxu1 %vm710_vm1, %v1445_v9 }
 0x121   : > { %3427 = vmatmul.mubr.msk.f32.gmra.mrb[18].mxu0 %vm710_vm1, %v1480_v36 }
 0x122   : > { %3429 = vmatprep.mubr.msk.f32.mxu0 %vm710_vm1, %v1472_v30 }
 0x125   : > { %3430 = vmatmul.mubr.msk.f32.gmra.mrb[20].mxu0 %vm710_vm1, %v1482_v33 }
 0x1d5   : > { %v4010_v42 = vpop.f32.mrb[6].mxu1 }
 0x1d6   : > { %v2007_v43 = vmul.f32 %v4010_v42, %v4008_v41  ;;  %v4014_v44 = vpop.f32.mrb[7].mxu1  ;;  %vm1998_vm5 = vcmp.ge.f32.partialorder %v4010_v42, 0.0 }
 0x1d7   : > { %vm1997_vm4 = vcmp.ge.f32.partialorder %v4014_v44, 0.0  ;;  %v2006_v45 = vmul.f32 %v4008_v41, %v4014_v44 }
 0x1d8   : > { %v2015_v50 = vsel %vm1998_vm5, %v4010_v42, %v2007_v43 }
 0x1d9   : > { %v4020_v46 = vpop.f32.mrb[8].mxu1  ;;  %v2014_v47 = vsel %vm1997_vm4, %v4014_v44, %v2006_v45 }
 0x1da   : > { %v4023_v48 = vpop.f32.mrb[9].mxu1  ;;  %3434 = vmatprep.mubr.msk.f32.mxu1 %vm710_vm1, %v2014_v47  ;;  %v2009_v51 = vmul.f32 %v4020_v46, %v4008_v41  ;;  %vm2000_vm7 = vcmp.ge.f32.partialorder %v4020_v46, 0.0 }
 0x1db   : > { %3435 = vmatmul.mubr.msk.f32.vlgmr.msra.gmra.mrb[22].mxu1 %vm710_vm1, %v2015_v50  ;;  %vm1999_vm6 = vcmp.ge.f32.partialorder %v4023_v48, 0.0  ;;  %v2008_v54 = vmul.f32 %v4008_v41, %v4023_v48 }
 0x1dc   : > { %v3394_v55 = vpop.f32.mrb[6].mxu0  ;;  %v2017_v61 = vsel %vm2000_vm7, %v4020_v46, %v2009_v51 }
 0x1dd   : > { %2660 = vrot.lane.b32.xlu1 %v3394_v55, %s3608_s30  ;;  %2165 = vrot.lane.b32.xlu0 %v3394_v55, %s3609_s22  ;;  %v4036_v56 = vpop.f32.mrb[10].mxu1  ;;  %v1710_v58 = vpop.f32.mrb[7].mxu0  ;;  %v2016_v59 = vsel %vm1999_vm6, %v4023_v48, %v2008_v54 }
 0x1de   : > { %v4039_v60 = vpop.f32.mrb[11].mxu1  ;;  %3437 = vmatprep.mubr.msk.f32.mxu1 %vm710_vm1, %v2016_v59  ;;  %v2011_v62 = vmul.f32 %v4036_v56, %v4008_v41  ;;  %vm2002_vm10 = vcmp.ge.f32.partialorder %v4036_v56, 0.0 }
 0x1df   : > { %3438 = vmatmul.mubr.msk.f32.gmra.mrb[24].mxu1 %vm710_vm1, %v2017_v61  ;;  %vm2001_vm8 = vcmp.ge.f32.partialorder %v4039_v60, 0.0  ;;  %v2010_v0 = vmul.f32 %v4008_v41, %v4039_v60 }
 0x1e0   : > { %v3397_v1 = vpop.f32.mrb[8].mxu0  ;;  %v2019_v6 = vsel %vm2002_vm10, %v4036_v56, %v2011_v62 }
 0x1e1   : > { %2658 = vrot.lane.b32.xlu1 %v1710_v58, %s3608_s30  ;;  %2163 = vrot.lane.b32.xlu0 %v1710_v58, %s3609_s22  ;;  %v4052_v2 = vpop.f32.mrb[12].mxu1  ;;  %v1720_v3 = vpop.f32.mrb[9].mxu0  ;;  %v2018_v4 = vsel %vm2001_vm8, %v4039_v60, %v2010_v0 }
 0x1e2   : > { %v4055_v5 = vpop.f32.mrb[13].mxu1  ;;  %3440 = vmatprep.mubr.msk.f32.mxu1 %vm710_vm1, %v2018_v4  ;;  %vm2004_vm11 = vcmp.ge.f32.partialorder %v4052_v2, 0.0  ;;  %v2013_v7 = vmul.f32 %v4052_v2, %v4008_v41 }
 0x1e3   : > { %3441 = vmatmul.mubr.msk.f32.gmra.mrb[26].mxu1 %vm710_vm1, %v2019_v6  ;;  %vm2003_vm12 = vcmp.ge.f32.partialorder %v4055_v5, 0.0  ;;  %v2012_v9 = vmul.f32 %v4008_v41, %v4055_v5 }
 0x1e4   : > { %v3400_v10 = vpop.f32.mrb[10].mxu0  ;;  %v2021_v11 = vsel %vm2004_vm11, %v4052_v2, %v2013_v7 }
 0x1e5   : > { %v3408_v12 = vpop.f32.mrb[14].mxu1  ;;  %2664 = vrot.lane.b32.xlu0 %v3397_v1, %s3608_s30  ;;  %2169 = vrot.lane.b32.xlu1 %v3397_v1, %s3609_s22  ;;  %v1730_v13 = vpop.f32.mrb[11].mxu0  ;;  %v2020_v14 = vsel %vm2003_vm12, %v4055_v5, %v2012_v9 }
 0x1e6   : > { %v1825_v15 = vpop.f32.mrb[15].mxu1  ;;  %3443 = vmatprep.mubr.msk.f32.mxu1 %vm710_vm1, %v2020_v14 }
 0x1e7   : > { %3444 = vmatmul.mubr.msk.f32.gmra.mrb[28].mxu1 %vm710_vm1, %v2021_v11 }
 0x1e8   : > { %v3403_v16 = vpop.f32.mrb[12].mxu0 }
 0x1e9   : > { %v3411_v20 = vpop.f32.mrb[16].mxu1  ;;  %2662 = vrot.lane.b32.xlu0 %v1720_v3, %s3608_s30  ;;  %2167 = vrot.lane.b32.xlu1 %v1720_v3, %s3609_s22  ;;  %v1740_v21 = vpop.f32.mrb[13].mxu0 }
 0x1ea   : > { %v1835_v17 = vpop.f32.mrb[17].mxu1 }
 0x1ec   : > { %v3422_v24 = vpop.f32.mrb[14].mxu0 }
 0x1ed   : > { %v3414_v27 = vpop.f32.mrb[18].mxu1  ;;  %2668 = vrot.lane.b32.xlu0 %v3400_v10, %s3608_s30  ;;  %2173 = vrot.lane.b32.xlu1 %v3400_v10, %s3609_s22  ;;  %v1958_v29 = vpop.f32.mrb[15].mxu0 }
 0x1ee   : > { %v1845_v30 = vpop.f32.mrb[19].mxu1 }
 0x1f0   : > { %v3425_v31 = vpop.f32.mrb[16].mxu0 }
 0x1f1   : > { %2423 = vrot.lane.b32.xlu1 %v3408_v12, %s3608_s30  ;;  %2171 = vrot.lane.b32.xlu0 %v1730_v13, %s3609_s22  ;;  %v1968_v32 = vpop.f32.mrb[17].mxu0  ;;  %v3417_v35 = vpop.f32.mrb[20].mxu1 }
 0x1f2   : > { %v1855_v36 = vpop.f32.mrb[21].mxu1 }
 0x1f4   : > { %v3428_v33 = vpop.f32.mrb[18].mxu0 }
 0x1f5   : > { %2427 = vrot.lane.b32.xlu1 %v3411_v20, %s3608_s30  ;;  %2666 = vrot.lane.b32.xlu0 %v1730_v13, %s3608_s30  ;;  %v1978_v40 = vpop.f32.mrb[19].mxu0 }
 0x1f8   : > { %v3431_v43 = vpop.f32.mrb[20].mxu0 }
 0x1f9   : > { %2421 = vrot.lane.b32.xlu0 %v1825_v15, %s3608_s30  ;;  %2708 = vrot.lane.b32.xlu1 %v3422_v24, %s3610_s28  ;;  %v1988_v45 = vpop.f32.mrb[21].mxu0 }
 0x1fd   : > { %2177 = vrot.lane.b32.xlu0 %v3403_v16, %s3609_s22  ;;  %2706 = vrot.lane.b32.xlu1 %v1958_v29, %s3610_s28 }
 0x201   : > { %2672 = vrot.lane.b32.xlu0 %v3403_v16, %s3608_s30  ;;  %2431 = vrot.lane.b32.xlu1 %v3414_v27, %s3608_s30 }
 0x205   : > { %2175 = vrot.lane.b32.xlu0 %v1740_v21, %s3609_s22  ;;  %2712 = vrot.lane.b32.xlu1 %v3425_v31, %s3610_s28 }
 0x209   : > { %2670 = vrot.lane.b32.xlu0 %v1740_v21, %s3608_s30  ;;  %2710 = vrot.lane.b32.xlu1 %v1968_v32, %s3610_s28 }
 0x20d   : > { %2425 = vrot.lane.b32.xlu0 %v1835_v17, %s3608_s30  ;;  %2716 = vrot.lane.b32.xlu1 %v3428_v33, %s3610_s28 }
 0x211   : > { %2429 = vrot.lane.b32.xlu0 %v1845_v30, %s3608_s30  ;;  %2714 = vrot.lane.b32.xlu1 %v1978_v40, %s3610_s28 }
 0x215   : > { %2433 = vrot.lane.b32.xlu0 %v1855_v36, %s3608_s30  ;;  %2435 = vrot.lane.b32.xlu1 %v3417_v35, %s3608_s30  ;;  %s3160_s30 = sshll.u32 %s566_s29, 3 }
 0x219   : > { %2720 = vrot.lane.b32.xlu1 %v3431_v43, %s3610_s28  ;;  %2718 = vrot.lane.b32.xlu0 %v1988_v45, %s3610_s28 }
 0x24f   : > { %v2661_v47 = vpop.permute.xlu1 %2660  ;;  %v2166_v50 = vpop.permute.xlu0 %2165 }
 0x250   : > { %v2188_v51 = vadd.f32 %v4010_v42, %v2166_v50  ;;  %v2683_v33 = vadd.f32 %v4010_v42, %v2661_v47 }
 0x252   : > { %vm2196_vm14 = vcmp.ge.f32.partialorder %v2188_v51, 0.0  ;;  %v2204_v54 = vmul.f32 %v2188_v51, %v4008_v41 }
 0x253   : > { %v2659_v55 = vpop.permute.xlu1 %2658  ;;  %v2164_v58 = vpop.permute.xlu0 %2163 }
 0x254   : > { %v2187_v59 = vadd.f32 %v2164_v58, %v4014_v44  ;;  %v2212_v61 = vsel %vm2196_vm14, %v2188_v51, %v2204_v54  ;;  %v4122_v54 = vld [vmem:[%s4816_s9] sm:$0xf] }
 0x255   : > { %2229 = vrot.lane.b32.xlu1 %v2212_v61, %s3611_s12  ;;  %3474 = vmatprep.subr.msk.mxu0 %vm735_vm0, %v4122_v54  ;;  %v2682_v61 = vadd.f32 %v2659_v55, %v4014_v44 }
 0x256   : > { %vm2195_vm4 = vcmp.ge.f32.partialorder %v2187_v59, 0.0  ;;  %v2203_v62 = vmul.f32 %v2187_v59, %v4008_v41  ;;  %3460 = vmatprep.subr.msk.mxu1 %vm735_vm0, %v4122_v54 }
 0x257   : > { %v2665_v0 = vpop.permute.xlu0 %2664  ;;  %v2170_v1 = vpop.permute.xlu1 %2169  ;;  %3461 = vmatpush3.msk.msra.mxu1 %vm735_vm0, %v4122_v54 }
 0x258   : > { %v2190_v3 = vadd.f32 %v4020_v46, %v2170_v1  ;;  %v2211_v4 = vsel %vm2195_vm4, %v2187_v59, %v2203_v62  ;;  %v2685_v62 = vadd.f32 %v4020_v46, %v2665_v0 }
 0x259   : > { %2227 = vrot.lane.b32.xlu0 %v2211_v4, %s3611_s12 }
 0x25a   : > { %vm2198_vm5 = vcmp.ge.f32.partialorder %v2190_v3, 0.0  ;;  %v2206_v6 = vmul.f32 %v2190_v3, %v4008_v41 }
 0x25b   : > { %v4098_v7 = vpop.permute.xlu0 %2662  ;;  %v2168_v9 = vpop.permute.xlu1 %2167 }
 0x25c   : > { %v2189_v10 = vadd.f32 %v2168_v9, %v4023_v48  ;;  %v2214_v11 = vsel %vm2198_vm5, %v2190_v3, %v2206_v6 }
 0x25d   : > { %2233 = vrot.lane.b32.xlu1 %v2214_v11, %s3611_s12 }
 0x25e   : > { %vm2197_vm6 = vcmp.ge.f32.partialorder %v2189_v10, 0.0  ;;  %v2205_v12 = vmul.f32 %v2189_v10, %v4008_v41 }
 0x25f   : > { %v2669_v13 = vpop.permute.xlu0 %2668  ;;  %v2174_v14 = vpop.permute.xlu1 %2173 }
 0x260   : > { %v2192_v15 = vadd.f32 %v4036_v56, %v2174_v14  ;;  %v2213_v16 = vsel %vm2197_vm6, %v2189_v10, %v2205_v12 }
 0x261   : > { %2231 = vrot.lane.b32.xlu0 %v2213_v16, %s3611_s12 }
 0x262   : > { %vm2200_vm7 = vcmp.ge.f32.partialorder %v2192_v15, 0.0  ;;  %v2208_v20 = vmul.f32 %v2192_v15, %v4008_v41 }
 0x263   : > { %v4106_v21 = vpop.permute.xlu1 %2423  ;;  %v2172_v17 = vpop.permute.xlu0 %2171 }
 0x264   : > { %v2191_v24 = vadd.f32 %v2172_v17, %v4039_v60  ;;  %v2216_v27 = vsel %vm2200_vm7, %v2192_v15, %v2208_v20  ;;  %v2691_v40 = vadd.f32 %v2683_v33, %v4106_v21  ;;  %v2687_v17 = vadd.f32 %v4036_v56, %v2669_v13 }
 0x265   : > { %2237 = vrot.lane.b32.xlu1 %v2216_v27, %s3611_s12 }
 0x266   : > { %vm2199_vm8 = vcmp.ge.f32.partialorder %v2191_v24, 0.0  ;;  %v2207_v29 = vmul.f32 %v2191_v24, %v4008_v41 }
 0x267   : > { %v4111_v30 = vpop.permute.xlu1 %2427  ;;  %v2667_v31 = vpop.permute.xlu0 %2666 }
 0x268   : > { %v2215_v32 = vsel %vm2199_vm8, %v2191_v24, %v2207_v29  ;;  %v2693_v4 = vadd.f32 %v2685_v62, %v4111_v30  ;;  %v2686_v13 = vadd.f32 %v2667_v31, %v4039_v60 }
 0x269   : > { %2235 = vrot.lane.b32.xlu0 %v2215_v32, %s3611_s12  ;;  %v2684_v32 = vadd.f32 %v4098_v7, %v4023_v48 }
 0x26b   : > { %v4114_v35 = vpop.permute.xlu0 %2421  ;;  %v2709_v36 = vpop.permute.xlu1 %2708 }
 0x26c   : > { %v2731_v50 = vadd.f32 %v2709_v36, %v2691_v40  ;;  %v2690_v6 = vadd.f32 %v2682_v61, %v4114_v35 }
 0x26e   : > { %v2747_v3 = vmul.f32 %v2731_v50, %v4008_v41  ;;  %vm2739_vm11 = vcmp.ge.f32.partialorder %v2731_v50, 0.0 }
 0x26f   : > { %v2178_v43 = vpop.permute.xlu0 %2177  ;;  %v2707_v45 = vpop.permute.xlu1 %2706 }
 0x270   : > { %v2194_v51 = vadd.f32 %v4052_v2, %v2178_v43  ;;  %v2730_v11 = vadd.f32 %v2707_v45, %v2690_v6  ;;  %v2755_v15 = vsel %vm2739_vm11, %v2731_v50, %v2747_v3 }
 0x272   : > { %vm2202_vm10 = vcmp.ge.f32.partialorder %v2194_v51, 0.0  ;;  %v2210_v58 = vmul.f32 %v2194_v51, %v4008_v41  ;;  %v2746_v29 = vmul.f32 %v2730_v11, %v4008_v41  ;;  %vm2738_vm4 = vcmp.ge.f32.partialorder %v2730_v11, 0.0 }
 0x273   : > { %v2673_v47 = vpop.permute.xlu0 %2672  ;;  %v4129_v59 = vpop.permute.xlu1 %2431 }
 0x274   : > { %v2218_v1 = vsel %vm2202_vm10, %v2194_v51, %v2210_v58  ;;  %v2695_v36 = vadd.f32 %v2687_v17, %v4129_v59  ;;  %v2754_v50 = vsel %vm2738_vm4, %v2730_v11, %v2746_v29  ;;  %v2689_v11 = vadd.f32 %v4052_v2, %v2673_v47 }
 0x275   : > { %2241 = vrot.lane.b32.xlu1 %v2218_v1, %s3611_s12 }
 0x277   : > { %v2176_v9 = vpop.permute.xlu0 %2175  ;;  %v2713_v10 = vpop.permute.xlu1 %2712 }
 0x278   : > { %v2193_v12 = vadd.f32 %v2176_v9, %v4055_v5  ;;  %v2733_v14 = vadd.f32 %v2713_v10, %v2693_v4 }
 0x279   : > { %2772 = vrot.lane.b32.xlu1 %v2755_v15, %s3612_s15 }
 0x27a   : > { %vm2741_vm12 = vcmp.ge.f32.partialorder %v2733_v14, 0.0  ;;  %v2749_v55 = vmul.f32 %v2733_v14, %v4008_v41  ;;  %vm2201_vm14 = vcmp.ge.f32.partialorder %v2193_v12, 0.0  ;;  %v2209_v0 = vmul.f32 %v2193_v12, %v4008_v41 }
 0x27b   : > { %v2671_v16 = vpop.permute.xlu0 %2670  ;;  %v2711_v20 = vpop.permute.xlu1 %2710 }
 0x27c   : > { %v2757_v24 = vsel %vm2741_vm12, %v2733_v14, %v2749_v55  ;;  %v2217_v27 = vsel %vm2201_vm14, %v2193_v12, %v2209_v0  ;;  %v2688_v31 = vadd.f32 %v2671_v16, %v4055_v5  ;;  %v2446_v55 = vadd.f32 %v4010_v42, %v4106_v21 }
 0x27d   : > { %2776 = vrot.lane.b32.xlu1 %v2757_v24, %s3612_s15  ;;  %2239 = vrot.lane.b32.xlu0 %v2217_v27, %s3611_s12  ;;  %v2445_v24 = vadd.f32 %v4114_v35, %v4014_v44 }
 0x27e   : > { %vm2454_vm11 = vcmp.ge.f32.partialorder %v2446_v55, 0.0  ;;  %v2462_v42 = vmul.f32 %v2446_v55, %v4008_v41 }
 0x27f   : > { %v2426_v33 = vpop.permute.xlu0 %2425  ;;  %v2717_v40 = vpop.permute.xlu1 %2716  ;;  %v2461_v35 = vmul.f32 %v2445_v24, %v4008_v41  ;;  %vm2453_vm12 = vcmp.ge.f32.partialorder %v2445_v24, 0.0 }
 0x280   : > { %v2692_v43 = vadd.f32 %v2684_v32, %v2426_v33  ;;  %v2735_v45 = vadd.f32 %v2717_v40, %v2695_v36  ;;  %v2448_v32 = vadd.f32 %v4020_v46, %v4111_v30  ;;  %v2447_v21 = vadd.f32 %v2426_v33, %v4023_v48 }
 0x281   : > { %2770 = vrot.lane.b32.xlu0 %v2754_v50, %s3612_s15  ;;  %v2450_v40 = vadd.f32 %v4036_v56, %v4129_v59 }
 0x282   : > { %v2732_v51 = vadd.f32 %v2711_v20, %v2692_v43  ;;  %vm2743_vm5 = vcmp.ge.f32.partialorder %v2735_v45, 0.0  ;;  %v2751_v58 = vmul.f32 %v2735_v45, %v4008_v41  ;;  %v2470_v43 = vsel %vm2454_vm11, %v2446_v55, %v2462_v42 }
 0x283   : > { %v2430_v61 = vpop.permute.xlu0 %2429  ;;  %v2715_v62 = vpop.permute.xlu1 %2714  ;;  %v2464_v46 = vmul.f32 %v2448_v32, %v4008_v41  ;;  %vm2456_vm14 = vcmp.ge.f32.partialorder %v2448_v32, 0.0  ;;  %v2463_v48 = vmul.f32 %v2447_v21, %v4008_v41  ;;  %vm2455_vm4 = vcmp.ge.f32.partialorder %v2447_v21, 0.0 }
 0x284   : > { %v2694_v1 = vadd.f32 %v2686_v13, %v2430_v61  ;;  %v2759_v3 = vsel %vm2743_vm5, %v2735_v45, %v2751_v58  ;;  %vm2740_vm6 = vcmp.ge.f32.partialorder %v2732_v51, 0.0  ;;  %v2748_v7 = vmul.f32 %v2732_v51, %v4008_v41 }
 0x285   : > { %2780 = vrot.lane.b32.xlu1 %v2759_v3, %s3612_s15  ;;  %v2449_v30 = vadd.f32 %v2430_v61, %v4039_v60  ;;  %v2469_v45 = vsel %vm2453_vm12, %v2445_v24, %v2461_v35  ;;  %v2472_v33 = vsel %vm2456_vm14, %v2448_v32, %v2464_v46  ;;  %v2466_v50 = vmul.f32 %v2450_v40, %v4008_v41 }
 0x286   : > { %v2734_v4 = vadd.f32 %v2715_v62, %v2694_v1  ;;  %v2756_v10 = vsel %vm2740_vm6, %v2732_v51, %v2748_v7  ;;  %v2471_v59 = vsel %vm2455_vm4, %v2447_v21, %v2463_v48  ;;  %vm2458_vm5 = vcmp.ge.f32.partialorder %v2450_v40, 0.0 }
 0x287   : > { %v2434_v6 = vpop.permute.xlu0 %2433  ;;  %v2436_v9 = vpop.permute.xlu1 %2435  ;;  %2774 = vrot.lane.b32.xlu0 %v2756_v10, %s3612_s15  ;;  %v2465_v51 = vmul.f32 %v2449_v30, %v4008_v41  ;;  %vm2457_vm6 = vcmp.ge.f32.partialorder %v2449_v30, 0.0  ;;  %v2474_v60 = vsel %vm2458_vm5, %v2450_v40, %v2466_v50  ;;  %v4187_v7 = vmul.f32 0.75, %v3811_v22 }
 0x288   : > { %vm2742_vm7 = vcmp.ge.f32.partialorder %v2734_v4, 0.0  ;;  %v2750_v12 = vmul.f32 %v2734_v4, %v4008_v41  ;;  %v2696_v14 = vadd.f32 %v2688_v31, %v2434_v6  ;;  %v2697_v15 = vadd.f32 %v2689_v11, %v2436_v9 }
 0x289   : > { %v2451_v13 = vadd.f32 %v2434_v6, %v4055_v5  ;;  %v2452_v56 = vadd.f32 %v4052_v2, %v2436_v9  ;;  %v2473_v58 = vsel %vm2457_vm6, %v2449_v30, %v2465_v51  ;;  %v1091_v5 = vmul.f32 0.25, %v3838_v34 }
 0x28a   : > { %v2758_v20 = vsel %vm2742_vm7, %v2734_v4, %v2750_v12  ;;  %v1090_v2 = vmul.f32 0.25, %v3847_v39  ;;  %v4190_v4 = vmul.f32 0.75, %v3818_v25  ;;  %v1092_v10 = vmul.f32 0.25, %v3886_v53 }
 0x28b   : > { %v2721_v0 = vpop.permute.xlu1 %2720  ;;  %v2719_v17 = vpop.permute.xlu0 %2718  ;;  %2778 = vrot.lane.b32.xlu0 %v2758_v20, %s3612_s15  ;;  %v2468_v61 = vmul.f32 %v2452_v56, %v4008_v41  ;;  %v2467_v62 = vmul.f32 %v2451_v13, %v4008_v41  ;;  %vm2460_vm7 = vcmp.ge.f32.partialorder %v2452_v56, 0.0  ;;  %v4194_v6 = vadd.f32 %v1091_v5, %v4187_v7 }
 0x28c   : > { %v2737_v27 = vadd.f32 %v2721_v0, %v2697_v15  ;;  %v2736_v47 = vadd.f32 %v2719_v17, %v2696_v14  ;;  %v4197_v9 = vadd.f32 %v1090_v2, %v4190_v4  ;;  %v4201_v11 = vmul.f32 0.75, %v3838_v34 }
 0x28d   : > { %v2476_v1 = vsel %vm2460_vm7, %v2452_v56, %v2468_v61  ;;  %v4208_v31 = vmul.f32 0.75, %v3847_v39  ;;  %v4214_v14 = vmul.f32 0.75, %v3877_v49  ;;  %v1095_v55 = vmul.f32 0.25, %v3813_v23 }
 0x28e   : > { %v2753_v16 = vmul.f32 %v2737_v27, %v4008_v41  ;;  %v2752_v29 = vmul.f32 %v2736_v47, %v4008_v41  ;;  %vm2745_vm8 = vcmp.ge.f32.partialorder %v2737_v27, 0.0  ;;  %vm2744_vm10 = vcmp.ge.f32.partialorder %v2736_v47, 0.0 }
 0x28f   : > { %v1093_v41 = vmul.f32 0.25, %v3877_v49  ;;  %v4217_v15 = vadd.f32 %v1092_v10, %v4208_v31  ;;  %v4221_v0 = vmul.f32 0.75, %v3886_v53  ;;  %v1094_v20 = vmul.f32 0.25, %v3820_v26 }
 0x290   : > { %v2761_v36 = vsel %vm2745_vm8, %v2737_v27, %v2753_v16  ;;  %v2760_v44 = vsel %vm2744_vm10, %v2736_v47, %v2752_v29  ;;  %vm2459_vm8 = vcmp.ge.f32.partialorder %v2451_v13, 0.0  ;;  %v1097_v17 = vmul.f32 0.25, %v3892_v57 }
 0x291   : > { %2784 = vrot.lane.b32.xlu1 %v2761_v36, %s3612_s15  ;;  %2782 = vrot.lane.b32.xlu0 %v2760_v44, %s3612_s15  ;;  %v2475_v3 = vsel %vm2459_vm8, %v2451_v13, %v2467_v62  ;;  %v4211_v12 = vadd.f32 %v1093_v41, %v4201_v11  ;;  %v1096_v24 = vmul.f32 0.25, %v3906_v63  ;;  %v4231_v27 = vadd.f32 %v1095_v55, %v4214_v14 }
 0x292   : > { %v4234_v47 = vadd.f32 %v1094_v20, %v4221_v0  ;;  %v4237_v16 = vmul.f32 0.75, %v3813_v23  ;;  %v4240_v29 = vmul.f32 0.75, %v3820_v26 }
 0x294   : > { %v4251_v32 = vadd.f32 %v1097_v17, %v4237_v16  ;;  %v4254_v42 = vadd.f32 %v1096_v24, %v4240_v29 }
 0x295   : > { %2488 = vrot.lane.b32.xlu1 %v2470_v43, %s3613_s17  ;;  %2486 = vrot.lane.b32.xlu0 %v2469_v45, %s3613_s17 }
 0x299   : > { %2492 = vrot.lane.b32.xlu1 %v2472_v33, %s3613_s17  ;;  %2490 = vrot.lane.b32.xlu0 %v2471_v59, %s3613_s17 }
 0x29d   : > { %2496 = vrot.lane.b32.xlu1 %v2474_v60, %s3613_s17  ;;  %2494 = vrot.lane.b32.xlu0 %v2473_v58, %s3613_s17 }
 0x2a1   : > { %2500 = vrot.lane.b32.xlu1 %v2476_v1, %s3613_s17  ;;  %2498 = vrot.lane.b32.xlu0 %v2475_v3, %s3613_s17 }
 0x2a5   : > { %1238 = vrot.lane.b32.xlu1 %v4194_v6, %s3611_s12  ;;  %1236 = vrot.lane.b32.xlu0 %v4197_v9, %s3611_s12 }
 0x2a9   : > { %1242 = vrot.lane.b32.xlu1 %v4211_v12, %s3611_s12  ;;  %1240 = vrot.lane.b32.xlu0 %v4217_v15, %s3611_s12 }
 0x2ad   : > { %1246 = vrot.lane.b32.xlu1 %v4231_v27, %s3611_s12  ;;  %1244 = vrot.lane.b32.xlu0 %v4234_v47, %s3611_s12 }
 0x2ae   : > { %v4246_v57 = vpop.f32.mrb[22].mxu1 }
 0x2af   : > { %v4248_v63 = vpop.f32.mrb[23].mxu1 }
 0x2b1   : > { %1250 = vrot.lane.b32.xlu1 %v4251_v32, %s3611_s12  ;;  %1248 = vrot.lane.b32.xlu0 %v4254_v42, %s3611_s12 }
 0x2b2   : > { %v4260_v23 = vpop.f32.mrb[24].mxu1 }
 0x2b3   : > { %v4262_v26 = vpop.f32.mrb[25].mxu1 }
 0x2b6   : > { %v4264_v21 = vpop.f32.mrb[26].mxu1 }
 0x2b7   : > { %v4266_v36 = vpop.f32.mrb[27].mxu1 }
 0x2ba   : > { %v4268_v44 = vpop.f32.mrb[28].mxu1 }
 0x2bb   : > { %v4270_v35 = vpop.f32.mrb[29].mxu1 }
 0x2c7   : > { %v2230_v43 = vpop.permute.xlu1 %2229 }
 0x2cb   : > { %v2228_v40 = vpop.permute.xlu0 %2227 }
 0x2cc   : > { %3448 = vmatprep.mubr.msk.f32.mxu0 %vm710_vm1, %v2228_v40 }
 0x2cd   : > { %3449 = vmatmul.mubr.msk.f32.vlgmr.msra.gmra.mrb[22].mxu0 %vm710_vm1, %v2230_v43 }
 0x2ce   : > { %3475 = vmatpush3.msk.msra.mxu0 %vm735_vm0, %v4122_v54  ;;  %vm1114_vm0 = vcmp.lt.s32.totalorder %v3804_v19, 1 }
 0x2cf   : > { %v2234_v30 = vpop.permute.xlu1 %2233 }
 0x2d3   : > { %v2232_v46 = vpop.permute.xlu0 %2231 }
 0x2d4   : > { %3451 = vmatprep.mubr.msk.f32.mxu0 %vm710_vm1, %v2232_v46 }
 0x2d5   : > { %3452 = vmatmul.mubr.msk.f32.gmra.mrb[24].mxu0 %vm710_vm1, %v2234_v30 }
 0x2d7   : > { %v2238_v48 = vpop.permute.xlu1 %2237 }
 0x2db   : > { %v2236_v45 = vpop.permute.xlu0 %2235 }
 0x2dc   : > { %3454 = vmatprep.mubr.msk.f32.mxu0 %vm710_vm1, %v2236_v45 }
 0x2dd   : > { %3455 = vmatmul.mubr.msk.f32.gmra.mrb[26].mxu0 %vm710_vm1, %v2238_v48 }
 0x2e7   : > { %v2242_v33 = vpop.permute.xlu1 %2241 }
 0x2eb   : > { %v2773_v54 = vpop.permute.xlu1 %2772 }
 0x2ef   : > { %v2240_v50 = vpop.permute.xlu0 %2239  ;;  %v2777_v59 = vpop.permute.xlu1 %2776 }
 0x2f0   : > { %3457 = vmatprep.mubr.msk.f32.mxu0 %vm710_vm1, %v2240_v50 }
 0x2f1   : > { %3458 = vmatmul.mubr.msk.f32.gmra.mrb[28].mxu0 %vm710_vm1, %v2242_v33 }
 0x2f3   : > { %v2771_v13 = vpop.permute.xlu0 %2770 }
 0x2f4   : > { %3476 = vmatprep.mubr.msk.f32.mxu0 %vm710_vm1, %v2771_v13 }
 0x2f5   : > { %3477 = vmatmul.mubr.msk.f32.vlgmr.msra.gmra.mrb[30].mxu0 %vm710_vm1, %v2773_v54 }
 0x2f7   : > { %v2781_v60 = vpop.permute.xlu1 %2780 }
 0x2f9   : > { %v2775_v56 = vpop.permute.xlu0 %2774 }
 0x2fa   : > { %3479 = vmatprep.mubr.msk.f32.mxu0 %vm710_vm1, %v2775_v56 }
 0x2fb   : > { %3480 = vmatmul.mubr.msk.f32.gmra.mrb[32].mxu0 %vm710_vm1, %v2777_v59 }
 0x2fd   : > { %v2779_v51 = vpop.permute.xlu0 %2778 }
 0x2fe   : > { %3482 = vmatprep.mubr.msk.f32.mxu0 %vm710_vm1, %v2779_v51 }
 0x2ff   : > { %3483 = vmatmul.mubr.msk.f32.gmra.mrb[34].mxu0 %vm710_vm1, %v2781_v60 }
 0x303   : > { %v2785_v58 = vpop.permute.xlu1 %2784  ;;  %v2783_v61 = vpop.permute.xlu0 %2782 }
 0x304   : > { %3485 = vmatprep.mubr.msk.f32.mxu0 %vm710_vm1, %v2783_v61 }
 0x305   : > { %3486 = vmatmul.mubr.msk.f32.gmra.mrb[36].mxu0 %vm710_vm1, %v2785_v58 }
 0x307   : > { %v2489_v62 = vpop.permute.xlu1 %2488  ;;  %v2487_v5 = vpop.permute.xlu0 %2486 }
 0x308   : > { %3462 = vmatprep.mubr.msk.f32.mxu1 %vm710_vm1, %v2487_v5 }
 0x309   : > { %3463 = vmatmul.mubr.msk.f32.vlgmr.msra.gmra.mrb[30].mxu1 %vm710_vm1, %v2489_v62 }
 0x30b   : > { %v2493_v2 = vpop.permute.xlu1 %2492  ;;  %v2491_v1 = vpop.permute.xlu0 %2490 }
 0x30c   : > { %3465 = vmatprep.mubr.msk.f32.mxu1 %vm710_vm1, %v2491_v1 }
 0x30d   : > { %3466 = vmatmul.mubr.msk.f32.gmra.mrb[32].mxu1 %vm710_vm1, %v2493_v2 }
 0x30f   : > { %v2497_v3 = vpop.permute.xlu1 %2496  ;;  %v2495_v41 = vpop.permute.xlu0 %2494 }
 0x310   : > { %3468 = vmatprep.mubr.msk.f32.mxu1 %vm710_vm1, %v2495_v41 }
 0x311   : > { %3469 = vmatmul.mubr.msk.f32.gmra.mrb[34].mxu1 %vm710_vm1, %v2497_v3 }
 0x313   : > { %v2501_v10 = vpop.permute.xlu1 %2500  ;;  %v2499_v55 = vpop.permute.xlu0 %2498 }
 0x314   : > { %3471 = vmatprep.mubr.msk.f32.mxu1 %vm710_vm1, %v2499_v55 }
 0x315   : > { %3472 = vmatmul.mubr.msk.f32.gmra.mrb[36].mxu1 %vm710_vm1, %v2501_v10 }
 0x317   : > { %v4298_v20 = vpop.permute.xlu1 %1238  ;;  %v4300_v17 = vpop.permute.xlu0 %1236 }
 0x318   : > { %v1341_v43 = vrot.slane %v4298_v20, 1  ;;  %v1340_v59 = vrot.slane %v4300_v17, 1 }
 0x31a   : > { %v1354_v2 = vsel %vm1179_vm2, %v1340_v59, %v1341_v43 }
 0x31b   : > { %v4302_v24 = vpop.permute.xlu1 %1242  ;;  %v4304_v40 = vpop.permute.xlu0 %1240 }
 0x31c   : > { %v1342_v46 = vrot.slane %v4304_v40, 1  ;;  %v1343_v33 = vrot.slane %v4302_v24, 1 }
 0x31e   : > { %v1353_v30 = vsel %vm1179_vm2, %v1341_v43, %v1342_v46  ;;  %v1352_v5 = vsel %vm1179_vm2, %v1342_v46, %v1343_v33 }
 0x31f   : > { %v1247_v45 = vpop.permute.xlu1 %1246  ;;  %1366 = vrot.lane.b32.xlu0 %v1353_v30, %s3609_s22  ;;  %v1245_v48 = vpop.permute.xlu0 %1244 }
 0x320   : > { %v1344_v50 = vrot.slane %v1245_v48, 1  ;;  %v1345_v51 = vrot.slane %v1247_v45, 1 }
 0x322   : > { %v1351_v13 = vsel %vm1179_vm2, %v1343_v33, %v1344_v50  ;;  %v1350_v1 = vsel %vm1179_vm2, %v1344_v50, %v1345_v51 }
 0x323   : > { %v1251_v54 = vpop.permute.xlu1 %1250  ;;  %1370 = vrot.lane.b32.xlu1 %v1351_v13, %s3609_s22  ;;  %v1249_v56 = vpop.permute.xlu0 %1248 }
 0x324   : > { %v1347_v60 = vrot.slane %v1251_v54, 1  ;;  %v1346_v58 = vrot.slane %v1249_v56, 1 }
 0x326   : > { %v1355_v61 = vsel %vm1179_vm2, %v1347_v60, %v1340_v59  ;;  %v1349_v62 = vsel %vm1179_vm2, %v1345_v51, %v1346_v58  ;;  %v1348_v3 = vsel %vm1179_vm2, %v1346_v58, %v1347_v60  ;;  %v4418_v58 = vmul.f32 0.75, %v4197_v9 }
 0x327   : > { %1378 = vrot.lane.b32.xlu1 %v1355_v61, %s3609_s22  ;;  %1374 = vrot.lane.b32.xlu0 %v1349_v62, %s3609_s22  ;;  %v4421_v62 = vmul.f32 0.75, %v4251_v32 }
 0x32b   : > { %1368 = vrot.lane.b32.xlu1 %v1352_v5, %s3609_s22  ;;  %1364 = vrot.lane.b32.xlu0 %v1354_v2, %s3609_s22 }
 0x32f   : > { %1372 = vrot.lane.b32.xlu0 %v1350_v1, %s3609_s22  ;;  %1376 = vrot.lane.b32.xlu1 %v1348_v3, %s3609_s22 }
 0x333   : > { %1016 = vrot.lane.b32.xlu0 %v3818_v25, %s3611_s12  ;;  %1018 = vrot.lane.b32.xlu1 %v3811_v22, %s3611_s12  ;;  %v1262_v22 = vrot.slane %v4304_v40, 7  ;;  %v1267_v25 = vrot.slane %v1251_v54, 7  ;;  %v4413_v54 = vmul.f32 0.75, %v4231_v27 }
 0x337   : > { %1020 = vrot.lane.b32.xlu0 %v3847_v39, %s3611_s12  ;;  %1022 = vrot.lane.b32.xlu1 %v3838_v34, %s3611_s12  ;;  %v1261_v34 = vrot.slane %v4298_v20, 7  ;;  %v1260_v39 = vrot.slane %v4300_v17, 7 }
 0x33b   : > { %1024 = vrot.lane.b32.xlu0 %v3886_v53, %s3611_s12  ;;  %1026 = vrot.lane.b32.xlu1 %v3877_v49, %s3611_s12  ;;  %v1264_v49 = vrot.slane %v1245_v48, 7  ;;  %v1266_v53 = vrot.slane %v1249_v56, 7 }
 0x33d   : > { %v1268_v10 = vsel %vm1114_vm0, %v1266_v53, %v1267_v25 }
 0x33f   : > { %1058 = vrot.lane.b32.xlu0 %v4190_v4, %s3611_s12  ;;  %1060 = vrot.lane.b32.xlu1 %v4187_v7, %s3611_s12  ;;  %v1275_v7 = vsel %vm1114_vm0, %v1267_v25, %v1260_v39  ;;  %v1273_v4 = vsel %vm1114_vm0, %v1261_v34, %v1262_v22  ;;  %v4431_v25 = vmul.f32 0.75, %v4217_v15 }
 0x343   : > { %1062 = vrot.lane.b32.xlu0 %v4208_v31, %s3611_s12  ;;  %1064 = vrot.lane.b32.xlu1 %v4201_v11, %s3611_s12  ;;  %v1263_v11 = vrot.slane %v4302_v24, 7  ;;  %v1265_v31 = vrot.slane %v1247_v45, 7  ;;  %v4395_v24 = vmul.f32 0.75, %v4194_v6  ;;  %v4403_v45 = vmul.f32 0.75, %v4211_v12 }
 0x345   : > { %v1270_v41 = vsel %vm1114_vm0, %v1264_v49, %v1265_v31 }
 0x347   : > { %1066 = vrot.lane.b32.xlu0 %v4221_v0, %s3611_s12  ;;  %1068 = vrot.lane.b32.xlu1 %v4214_v14, %s3611_s12  ;;  %v1271_v14 = vsel %vm1114_vm0, %v1263_v11, %v1264_v49  ;;  %v1269_v0 = vsel %vm1114_vm0, %v1265_v31, %v1266_v53  ;;  %v4437_v53 = vmul.f32 0.75, %v4234_v47 }
 0x34b   : > { %1070 = vrot.lane.b32.xlu0 %v4240_v29, %s3611_s12  ;;  %1072 = vrot.lane.b32.xlu1 %v4237_v16, %s3611_s12  ;;  %v1274_v16 = vsel %vm1114_vm0, %v1260_v39, %v1261_v34  ;;  %v1272_v29 = vsel %vm1114_vm0, %v1262_v22, %v1263_v11 }
 0x34f   : > { %1284 = vrot.lane.b32.xlu0 %v1275_v7, %s3609_s22  ;;  %1288 = vrot.lane.b32.xlu1 %v1273_v4, %s3609_s22 }
 0x353   : > { %1292 = vrot.lane.b32.xlu0 %v1271_v14, %s3609_s22  ;;  %1296 = vrot.lane.b32.xlu1 %v1269_v0, %s3609_s22 }
 0x357   : > { %1286 = vrot.lane.b32.xlu0 %v1274_v16, %s3609_s22  ;;  %1290 = vrot.lane.b32.xlu1 %v1272_v29, %s3609_s22  ;;  %v4446_v16 = vmul.f32 0.75, %v4254_v42 }
 0x35b   : > { %1294 = vrot.lane.b32.xlu0 %v1270_v41, %s3609_s22  ;;  %1298 = vrot.lane.b32.xlu1 %v1268_v10, %s3609_s22 }
 0x391   : > { %v1367_v55 = vpop.permute.xlu0 %1366 }
 0x392   : > { %v1389_v20 = vsel %vm3882_vm9, %v4194_v6, %v1367_v55 }
 0x393   : > { %v1397_v17 = vmul.f32 0.25, %v1389_v20  ;;  %v1035_v20 = vmul.f32 0.25, %v3997_v37 }
 0x395   : > { %v1371_v40 = vpop.permute.xlu1 %1370  ;;  %v1405_v43 = vadd.f32 %v1397_v17, %v4395_v24 }
 0x396   : > { %v1391_v46 = vsel %vm3919_vm13, %v4211_v12, %v1371_v40  ;;  %v575_v40 = vadd.s32 16, %v3804_v19 }
 0x397   : > { %v1399_v30 = vmul.f32 0.25, %v1391_v46  ;;  %2796 = vrot.lane.b32.xlu1 %v1405_v43, %s3611_s12  ;;  %v1034_v43 = vmul.f32 0.25, %v3999_v38  ;;  %v577_v38 = vadd.s32 32, %v3804_v19 }
 0x399   : > { %v1379_v48 = vpop.permute.xlu1 %1378  ;;  %v1375_v33 = vpop.permute.xlu0 %1374  ;;  %v1407_v50 = vadd.f32 %v1399_v30, %v4403_v45 }
 0x39a   : > { %v1395_v6 = vsel %vm3955_vm3, %v4251_v32, %v1379_v48  ;;  %v1393_v13 = vsel %vm3942_vm15, %v4231_v27, %v1375_v33 }
 0x39b   : > { %v1401_v56 = vmul.f32 0.25, %v1393_v13  ;;  %2800 = vrot.lane.b32.xlu1 %v1407_v50, %s3611_s12  ;;  %v1403_v12 = vmul.f32 0.25, %v1395_v6 }
 0x39d   : > { %v1409_v59 = vadd.f32 %v1401_v56, %v4413_v54  ;;  %v1369_v51 = vpop.permute.xlu1 %1368  ;;  %v1365_v60 = vpop.permute.xlu0 %1364  ;;  %v1411_v1 = vadd.f32 %v1403_v12, %v4421_v62  ;;  %v599_v56 = vand.u32 15, %v575_v40 }
 0x39e   : > { %v1396_v61 = vmul.f32 0.25, %v1365_v60  ;;  %v1398_v5 = vmul.f32 0.25, %v1369_v51 }
 0x39f   : > { %2804 = vrot.lane.b32.xlu1 %v1409_v59, %s3611_s12  ;;  %vm4478_vm10 = vcmp.eq.s32.totalorder %v599_v56, 0 }
 0x3a0   : > { %v1404_v27 = vadd.f32 %v1396_v61, %v4418_v58  ;;  %v4425_v2 = vpop.f32.mrb[22].mxu0  ;;  %v1406_v32 = vadd.f32 %v1398_v5, %v4431_v25 }
 0x3a1   : > { %v4428_v3 = vpop.f32.mrb[23].mxu0  ;;  %v1377_v22 = vpop.permute.xlu1 %1376 }
 0x3a2   : > { %v1373_v34 = vpop.permute.xlu0 %1372  ;;  %2794 = vrot.lane.b32.xlu0 %v1404_v27, %s3611_s12  ;;  %v1402_v4 = vmul.f32 0.25, %v1377_v22 }
 0x3a3   : > { %2808 = vrot.lane.b32.xlu1 %v1411_v1, %s3611_s12  ;;  %v1400_v39 = vmul.f32 0.25, %v1373_v34 }
 0x3a4   : > { %v1410_v41 = vadd.f32 %v1402_v4, %v4446_v16 }
 0x3a5   : > { %v1019_v49 = vpop.permute.xlu1 %1018  ;;  %v1408_v11 = vadd.f32 %v1400_v39, %v4437_v53 }
 0x3a6   : > { %v1017_v7 = vpop.permute.xlu0 %1016  ;;  %2798 = vrot.lane.b32.xlu0 %v1406_v32, %s3611_s12  ;;  %v1037_v61 = vmul.f32 0.25, %v1019_v49 }
 0x3a7   : > { %v1036_v37 = vmul.f32 0.25, %v1017_v7 }
 0x3a8   : > { %v4441_v31 = vpop.f32.mrb[24].mxu0 }
 0x3a9   : > { %v4443_v14 = vpop.f32.mrb[25].mxu0  ;;  %v1023_v0 = vpop.permute.xlu1 %1022 }
 0x3aa   : > { %v1021_v29 = vpop.permute.xlu0 %1020  ;;  %2802 = vrot.lane.b32.xlu0 %v1408_v11, %s3611_s12  ;;  %v613_v11 = vand.u32 15, %v577_v38 }
 0x3ab   : > { %v1038_v39 = vmul.f32 0.25, %v1021_v29 }
 0x3ac   : > { %vm4500_vm11 = vcmp.eq.s32.totalorder %v613_v11, 0 }
 0x3ad   : > { %v1027_v10 = vpop.permute.xlu1 %1026 }
 0x3ae   : > { %v1025_v55 = vpop.permute.xlu0 %1024  ;;  %2806 = vrot.lane.b32.xlu0 %v1410_v41, %s3611_s12  ;;  %v1041_v56 = vmul.f32 0.25, %v1027_v10 }
 0x3b0   : > { %v4452_v17 = vpop.f32.mrb[26].mxu0 }
 0x3b1   : > { %v4456_v46 = vpop.f32.mrb[27].mxu0  ;;  %v1061_v30 = vpop.permute.xlu1 %1060 }
 0x3b2   : > { %v4458_v48 = vadd.f32 %v1061_v30, %v1035_v20  ;;  %v1059_v33 = vpop.permute.xlu0 %1058  ;;  %v585_v20 = vand.u32 15, %v3804_v19 }
 0x3b3   : > { %v4460_v50 = vadd.f32 %v1059_v33, %v1034_v43  ;;  %v579_v33 = vadd.s32 48, %v3804_v19 }
 0x3b4   : > { %v1107_v6 = vrot.slane %v4458_v48, 7  ;;  %v1172_v13 = vrot.slane %v4458_v48, 1  ;;  %vm4506_vm12 = vcmp.eq.s32.totalorder %v585_v20, 0  ;;  %v1156_v28 = vmul.f32 0.75, %v4458_v48 }
 0x3b5   : > { %v1106_v12 = vrot.slane %v4460_v50, 7  ;;  %v1171_v59 = vrot.slane %v4460_v50, 1  ;;  %v1065_v51 = vpop.permute.xlu1 %1064  ;;  %v4476_v22 = vmul.f32 0.75, %v4460_v50 }
 0x3b6   : > { %v1063_v60 = vpop.permute.xlu0 %1062  ;;  %v4482_v7 = vadd.f32 %v1065_v51, %v1037_v61  ;;  %v1040_v51 = vmul.f32 0.25, %v1025_v55 }
 0x3b7   : > { %v4467_v5 = vadd.f32 %v1063_v60, %v1036_v37  ;;  %v1186_v27 = vsel %vm1179_vm2, %v1171_v59, %v1172_v13  ;;  %v4473_v1 = vsel %vm1114_vm0, %v1106_v12, %v1107_v6 }
 0x3b8   : > { %v1212_v32 = vmul.f32 0.25, %v1186_v27  ;;  %v1109_v38 = vrot.slane %v4482_v7, 7 }
 0x3b9   : > { %v4822_v49 = vrot.slane %v4467_v5, 7  ;;  %v1069_v4 = vpop.permute.xlu1 %1068  ;;  %v1173_v43 = vrot.slane %v4467_v5, 1 }
 0x3ba   : > { %v1067_v41 = vpop.permute.xlu0 %1066  ;;  %v1220_v40 = vadd.f32 %v1212_v32, %v4476_v22  ;;  %v1039_v32 = vmul.f32 0.25, %v1023_v0 }
 0x3bb   : > { %v4488_v30 = vadd.f32 %v1067_v41, %v1038_v39  ;;  %v1120_v29 = vsel %vm1114_vm0, %v1107_v6, %v4822_v49  ;;  %v1185_v55 = vsel %vm1179_vm2, %v1172_v13, %v1173_v43 }
 0x3bc   : > { %v1141_v37 = vsel %vm4478_vm10, %v4467_v5, %v1120_v29  ;;  %v4511_v41 = vadd.f32 %v4428_v3, %v1220_v40  ;;  %v627_v29 = vand.u32 15, %v579_v33  ;;  %v4525_v20 = vadd.f32 %v1069_v4, %v1039_v32 }
 0x3bd   : > { %v4819_v60 = vrot.slane %v4488_v30, 7  ;;  %v1073_v61 = vpop.permute.xlu1 %1072  ;;  %v1205_v32 = vsel %vm3882_vm9, %v4458_v48, %v1185_v55  ;;  %v4583_v48 = vmul.f32 0.75, %v4482_v7  ;;  %v1149_v27 = vmul.f32 0.25, %v1141_v37 }
 0x3be   : > { %v4504_v39 = vadd.f32 %v1073_v61, %v1041_v56  ;;  %v1071_v6 = vpop.permute.xlu0 %1070  ;;  %vm4551_vm14 = vcmp.eq.s32.totalorder %v627_v29, 0 }
 0x3bf   : > { %v4517_v11 = vadd.f32 %v1071_v6, %v1040_v51  ;;  %v1118_v0 = vsel %vm1114_vm0, %v1109_v38, %v4819_v60  ;;  %v1148_v60 = vmul.f32 0.25, %v4473_v1 }
 0x3c0   : > { %v1113_v3 = vrot.slane %v4504_v39, 7  ;;  %v4820_v40 = vrot.slane %v4504_v39, 1  ;;  %v1143_v13 = vsel %vm4500_vm11, %v4488_v30, %v1118_v0 }
 0x3c1   : > { %v1112_v56 = vrot.slane %v4517_v11, 7  ;;  %v1289_v33 = vpop.permute.xlu1 %1288 }
 0x3c2   : > { %v1122_v51 = vsel %vm1114_vm0, %v1113_v3, %v1106_v12  ;;  %v1285_v61 = vpop.permute.xlu0 %1284  ;;  %v1187_v4 = vsel %vm1179_vm2, %v4820_v40, %v1171_v59  ;;  %v1310_v6 = vsel %vm4478_vm10, %v4217_v15, %v1289_v33  ;;  %v4821_v59 = vrot.slane %v4525_v20, 7 }
 0x3c3   : > { %v1139_v0 = vsel %vm4506_vm12, %v4460_v50, %v1122_v51  ;;  %v1308_v12 = vsel %vm4506_vm12, %v4197_v9, %v1285_v61  ;;  %v1115_v55 = vsel %vm1114_vm0, %v1112_v56, %v1113_v3  ;;  %v1211_v15 = vsel %vm3955_vm3, %v4504_v39, %v1187_v4 }
 0x3c4   : > { %v1316_v52 = vmul.f32 0.25, %v1308_v12  ;;  %v3459_v34 = vpop.f32.mrb[28].mxu0  ;;  %v1154_v50 = vmul.f32 0.25, %v1115_v55  ;;  %v1162_v33 = vmul.f32 0.75, %v4504_v39  ;;  %v1219_v10 = vmul.f32 0.25, %v1211_v15 }
 0x3c5   : > { %v4562_v9 = vpop.f32.mrb[29].mxu0  ;;  %v1297_v29 = vpop.permute.xlu1 %1296  ;;  %v1213_v51 = vmul.f32 0.25, %v1205_v32  ;;  %v1318_v61 = vmul.f32 0.25, %v1310_v6  ;;  %v1116_v3 = vsel %vm1114_vm0, %v4821_v59, %v1112_v56  ;;  %v1174_v32 = vrot.slane %v4482_v7, 1 }
 0x3c6   : > { %v1332_v40 = vadd.f32 %v4418_v58, %v1316_v52  ;;  %v1293_v12 = vpop.permute.xlu0 %1292  ;;  %v4570_v4 = vadd.f32 %v1162_v33, %v1154_v50  ;;  %v1227_v55 = vadd.f32 %v1219_v10, %v1162_v33  ;;  %v1145_v15 = vsel %vm4551_vm14, %v4517_v11, %v1116_v3 }
 0x3c7   : > { %v1147_v6 = vmul.f32 0.25, %v1139_v0  ;;  %v1312_v58 = vsel %vm4500_vm11, %v4234_v47, %v1293_v12  ;;  %v1314_v50 = vsel %vm4551_vm14, %v4254_v42, %v1297_v29  ;;  %v1221_v0 = vadd.f32 %v1213_v51, %v1156_v28 }
 0x3c8   : > { %2510 = vrot.lane.b32.xlu0 %v1332_v40, %s3611_s12  ;;  %v4580_v56 = vpop.f32.mrb[30].mxu0  ;;  %v4585_v52 = vadd.f32 %v3459_v34, %v1227_v55  ;;  %v1157_v10 = vmul.f32 0.75, %v4467_v5  ;;  %v1334_v47 = vadd.f32 %v4431_v25, %v1318_v61  ;;  %v1320_v40 = vmul.f32 0.25, %v1312_v58 }
 0x3c9   : > { %v4590_v33 = vpop.f32.mrb[31].mxu0  ;;  %v1291_v3 = vpop.permute.xlu1 %1290  ;;  %v1175_v59 = vrot.slane %v4488_v30, 1  ;;  %v4596_v34 = vadd.f32 %v4425_v2, %v1221_v0  ;;  %v1322_v42 = vmul.f32 0.25, %v1314_v50  ;;  %v1151_v29 = vmul.f32 0.25, %v1143_v13 }
 0x3ca   : > { %v1287_v12 = vpop.permute.xlu0 %1286  ;;  %v1184_v25 = vsel %vm1179_vm2, %v1173_v43, %v1174_v32  ;;  %v1163_v37 = vadd.f32 %v4476_v22, %v1147_v6  ;;  %v4606_v51 = vmul.f32 0.75, %v4525_v20  ;;  %v1159_v61 = vmul.f32 0.75, %v4488_v30 }
 0x3cb   : > { %v1317_v49 = vmul.f32 0.25, %v1287_v12  ;;  %v1319_v2 = vmul.f32 0.25, %v1291_v3  ;;  %v1153_v1 = vmul.f32 0.25, %v1145_v15  ;;  %v1336_v13 = vadd.f32 %v4437_v53, %v1320_v40 }
 0x3cc   : > { %2514 = vrot.lane.b32.xlu0 %v1334_v47, %s3611_s12  ;;  %v4612_v50 = vadd.f32 %v4248_v63, %v1163_v37  ;;  %v1165_v0 = vadd.f32 %v1157_v10, %v1149_v27  ;;  %v1176_v43 = vrot.slane %v4525_v20, 1  ;;  %v1183_v22 = vsel %vm1179_vm2, %v1174_v32, %v1175_v59 }
 0x3cd   : > { %v1333_v55 = vadd.f32 %v4395_v24, %v1317_v49  ;;  %v1214_v47 = vmul.f32 0.25, %v1184_v25  ;;  %v1164_v3 = vadd.f32 %v1156_v28, %v1148_v60  ;;  %v1161_v24 = vmul.f32 0.75, %v4517_v11  ;;  %v1299_v12 = vpop.permute.xlu1 %1298 }
 0x3ce   : > { %v1295_v58 = vpop.permute.xlu0 %1294  ;;  %v4617_v6 = vpop.f32.mrb[32].mxu0  ;;  %v1338_v53 = vadd.f32 %v4446_v16, %v1322_v42  ;;  %v4626_v63 = vadd.f32 %v4262_v26, %v1165_v0  ;;  %v1167_v15 = vadd.f32 %v1159_v61, %v1151_v29  ;;  %v1335_v32 = vadd.f32 %v4403_v45, %v1319_v2 }
 0x3cf   : > { %2512 = vrot.lane.b32.xlu1 %v1333_v55, %s3611_s12  ;;  %v4622_v49 = vpop.f32.mrb[33].mxu0  ;;  %v1321_v27 = vmul.f32 0.25, %v1295_v58  ;;  %v4630_v40 = vadd.f32 %v4246_v57, %v1164_v3  ;;  %v4841_v28 = vrot.slane %v4467_v5, 7  ;;  %v1169_v42 = vadd.f32 %v1161_v24, %v1153_v1 }
 0x3d0   : > { %2518 = vrot.lane.b32.xlu0 %v1336_v13, %s3611_s12  ;;  %v4639_v60 = vadd.f32 %v4266_v36, %v1167_v15  ;;  %v4842_v29 = vrot.slane %v4525_v20, 7  ;;  %v4843_v45 = vrot.slane %v4488_v30, 7  ;;  %v1177_v25 = vrot.slane %v4517_v11, 1 }
 0x3d1   : > { %v1119_v16 = vsel %vm1114_vm0, %v4841_v28, %v1109_v38  ;;  %v1182_v5 = vsel %vm1179_vm2, %v1175_v59, %v1176_v43  ;;  %v4653_v36 = vadd.f32 %v4268_v44, %v4570_v4  ;;  %v4660_v55 = vadd.f32 %v4270_v35, %v1169_v42 }
 0x3d2   : > { %v1150_v26 = vmul.f32 0.25, %v1119_v16  ;;  %v1117_v57 = vsel %vm1114_vm0, %v4843_v45, %v4842_v29  ;;  %v3484_v37 = vpop.f32.mrb[34].mxu0  ;;  %v1323_v11 = vmul.f32 0.25, %v1299_v12  ;;  %v1337_v1 = vadd.f32 %v4413_v54, %v1321_v27 }
 0x3d3   : > { %2516 = vrot.lane.b32.xlu1 %v1335_v32, %s3611_s12  ;;  %v1152_v38 = vmul.f32 0.25, %v1117_v57  ;;  %v4655_v2 = vpop.f32.mrb[35].mxu0  ;;  %v1222_v59 = vadd.f32 %v1214_v47, %v1157_v10  ;;  %v1216_v58 = vmul.f32 0.25, %v1182_v5  ;;  %v1207_v44 = vsel %vm3919_vm13, %v4482_v7, %v1183_v22 }
 0x3d4   : > { %2522 = vrot.lane.b32.xlu0 %v1338_v53, %s3611_s12  ;;  %v1166_v30 = vadd.f32 %v4583_v48, %v1150_v26  ;;  %v1181_v0 = vsel %vm1179_vm2, %v1176_v43, %v1177_v25  ;;  %v4844_v35 = vrot.slane %v4504_v39, 1  ;;  %v1215_v10 = vmul.f32 0.25, %v1207_v44 }
 0x3d5   : > { %v1168_v13 = vadd.f32 %v4606_v51, %v1152_v38  ;;  %v2336_v39 = vadd.f32 %v4443_v14, %v1222_v59  ;;  %v1224_v22 = vadd.f32 %v1216_v58, %v1159_v61  ;;  %v1209_v19 = vsel %vm3942_vm15, %v4525_v20, %v1181_v0 }
 0x3d6   : > { %v4668_v4 = vadd.f32 %v4260_v23, %v1166_v30  ;;  %v1180_v3 = vsel %vm1179_vm2, %v1177_v25, %v4844_v35  ;;  %v1339_v23 = vadd.f32 %v4421_v62, %v1323_v11  ;;  %v1223_v47 = vadd.f32 %v1215_v10, %v4583_v48 }
 0x3d7   : > { %2520 = vrot.lane.b32.xlu1 %v1337_v1, %s3611_s12  ;;  %v4678_v54 = vadd.f32 %v4264_v21, %v1168_v13  ;;  %v1218_v43 = vmul.f32 0.25, %v1180_v3  ;;  %v1217_v62 = vmul.f32 0.25, %v1209_v19  ;;  %v2346_v15 = vadd.f32 %v4456_v46, %v1224_v22 }
 0x3d8   : > { %2372 = vrot.lane.b32.xlu0 %v4511_v41, %s3614_s26  ;;  %v3487_v8 = vpop.f32.mrb[36].mxu0  ;;  %v2341_v20 = vadd.f32 %v4441_v31, %v1223_v47  ;;  %vm2396_vm2 = vcmask 15360  }
 0x3d9   : > { %v2930_v7 = vpop.f32.mrb[37].mxu0  ;;  %v1226_v53 = vadd.f32 %v1218_v43, %v1161_v24  ;;  %v1225_v61 = vadd.f32 %v1217_v62, %v4606_v51 }
 0x3db   : > { %2524 = vrot.lane.b32.xlu1 %v1339_v23, %s3611_s12  ;;  %v2356_v32 = vadd.f32 %v4562_v9, %v1226_v53  ;;  %s4730_s12 = scalar_lea.vmem %s4818_s11, %s3160_s30 }
 0x3dc   : > { %2376 = vrot.lane.b32.xlu0 %v2336_v39, %s3614_s26  ;;  %v4689_v21 = vpop.f32.mrb[30].mxu1 }
 0x3dd   : > { %v2619_v41 = vpop.f32.mrb[31].mxu1 }
 0x3df   : > { %2374 = vrot.lane.b32.xlu1 %v4596_v34, %s3614_s26  ;;  %v2351_v34 = vadd.f32 %v4452_v17, %v1225_v61 }
 0x3e0   : > { %2380 = vrot.lane.b32.xlu0 %v2346_v15, %s3614_s26  ;;  %v4696_v18 = vpop.f32.mrb[32].mxu1 }
 0x3e1   : > { %v2629_v14 = vpop.f32.mrb[33].mxu1 }
 0x3e3   : > { %2378 = vrot.lane.b32.xlu1 %v2341_v20, %s3614_s26 }
 0x3e4   : > { %2384 = vrot.lane.b32.xlu0 %v2356_v32, %s3614_s26  ;;  %v4703_v48 = vpop.f32.mrb[34].mxu1 }
 0x3e5   : > { %v2639_v46 = vpop.f32.mrb[35].mxu1 }
 0x3e7   : > { %2382 = vrot.lane.b32.xlu1 %v2351_v34, %s3614_s26 }
 0x3e8   : > { %v4707_v24 = vpop.f32.mrb[36].mxu1 }
 0x3e9   : > { %v2649_v27 = vpop.f32.mrb[37].mxu1 }
 0x3eb   : > { %2386 = vrot.lane.b32.xlu1 %v4585_v52, %s3614_s26 }
 0x409   : > { %v2797_v31 = vpop.permute.xlu1 %2796 }
 0x40a   : > { %v2906_v9 = vadd.f32 %v4580_v56, %v2797_v31 }
 0x40c   : > { %2949 = vrot.lane.b32.xlu1 %v2906_v9, %s3614_s26 }
 0x40d   : > { %v2801_v51 = vpop.permute.xlu1 %2800 }
 0x40e   : > { %v2916_v28 = vadd.f32 %v4617_v6, %v2801_v51 }
 0x410   : > { %2953 = vrot.lane.b32.xlu1 %v2916_v28, %s3614_s26 }
 0x411   : > { %v2805_v16 = vpop.permute.xlu1 %2804 }
 0x412   : > { %v2926_v17 = vadd.f32 %v3484_v37, %v2805_v16 }
 0x414   : > { %2957 = vrot.lane.b32.xlu1 %v2926_v17, %s3614_s26  ;;  %v2795_v12 = vpop.permute.xlu0 %2794 }
 0x415   : > { %v2901_v26 = vadd.f32 %v4590_v33, %v2795_v12  ;;  %v2809_v42 = vpop.permute.xlu1 %2808 }
 0x416   : > { %v2936_v52 = vadd.f32 %v3487_v8, %v2809_v42 }
 0x417   : > { %2947 = vrot.lane.b32.xlu0 %v2901_v26, %s3614_s26 }
 0x418   : > { %2961 = vrot.lane.b32.xlu1 %v2936_v52, %s3614_s26  ;;  %v2799_v56 = vpop.permute.xlu0 %2798 }
 0x419   : > { %v2911_v6 = vadd.f32 %v4622_v49, %v2799_v56 }
 0x41b   : > { %2951 = vrot.lane.b32.xlu0 %v2911_v6, %s3614_s26 }
 0x41c   : > { %v2803_v29 = vpop.permute.xlu0 %2802 }
 0x41d   : > { %v2921_v45 = vadd.f32 %v4655_v2, %v2803_v29 }
 0x41f   : > { %2955 = vrot.lane.b32.xlu0 %v2921_v45, %s3614_s26 }
 0x420   : > { %v2807_v57 = vpop.permute.xlu0 %2806 }
 0x421   : > { %v2931_v33 = vadd.f32 %v2930_v7, %v2807_v57 }
 0x423   : > { %2959 = vrot.lane.b32.xlu0 %v2931_v33, %s3614_s26 }
 0x43a   : > { %v2511_v25 = vpop.permute.xlu0 %2510 }
 0x43b   : > { %v2620_v37 = vadd.f32 %v2619_v41, %v2511_v25 }
 0x43e   : > { %v2515_v5 = vpop.permute.xlu0 %2514 }
 0x43f   : > { %v2630_v38 = vadd.f32 %v2629_v14, %v2515_v5 }
 0x441   : > { %v2513_v49 = vpop.permute.xlu1 %2512 }
 0x442   : > { %v2519_v30 = vpop.permute.xlu0 %2518  ;;  %v2625_v19 = vadd.f32 %v4689_v21, %v2513_v49 }
 0x443   : > { %v2640_v11 = vadd.f32 %v2639_v46, %v2519_v30 }
 0x445   : > { %v2517_v1 = vpop.permute.xlu1 %2516 }
 0x446   : > { %v2523_v2 = vpop.permute.xlu0 %2522 }
 0x447   : > { %v2650_v13 = vadd.f32 %v2649_v27, %v2523_v2 }
 0x449   : > { %v2521_v59 = vpop.permute.xlu1 %2520 }
 0x44a   : > { %v2373_v58 = vpop.permute.xlu0 %2372 }
 0x44b   : > { %v2397_v44 = vsel %vm2396_vm2, %v4612_v50, %v2373_v58 }
 0x44c   : > { %2405 = vst.msk [vmem:[%s4730_s12] sm:$0xff] %vm710_vm1, %v2397_v44 }
 0x44d   : > { %v2525_v0 = vpop.permute.xlu1 %2524 }
 0x44e   : > { %v2377_v35 = vpop.permute.xlu0 %2376  ;;  %v2655_v15 = vadd.f32 %v4707_v24, %v2525_v0 }
 0x44f   : > { %v2399_v3 = vsel %vm2396_vm2, %v4626_v63, %v2377_v35 }
 0x450   : > { %2407 = vst.msk [vmem:[%s4730_s12 + $0x20] sm:$0xff] %vm710_vm1, %v2399_v3 }
 0x451   : > { %v2375_v8 = vpop.permute.xlu1 %2374 }
 0x452   : > { %v2398_v23 = vsel %vm2396_vm2, %v4630_v40, %v2375_v8  ;;  %v2381_v7 = vpop.permute.xlu0 %2380 }
 0x453   : > { %2406 = vst.msk [vmem:[%s4730_s12 + $0x8] sm:$0xff] %vm710_vm1, %v2398_v23  ;;  %v2401_v50 = vsel %vm2396_vm2, %v4639_v60, %v2381_v7 }
 0x454   : > { %2409 = vst.msk [vmem:[%s4730_s12 + $0x40] sm:$0xff] %vm710_vm1, %v2401_v50 }
 0x455   : > { %v2379_v10 = vpop.permute.xlu1 %2378 }
 0x456   : > { %v2400_v63 = vsel %vm2396_vm2, %v4668_v4, %v2379_v10  ;;  %v2385_v43 = vpop.permute.xlu0 %2384 }
 0x457   : > { %2408 = vst.msk [vmem:[%s4730_s12 + $0x28] sm:$0xff] %vm710_vm1, %v2400_v63  ;;  %v2403_v40 = vsel %vm2396_vm2, %v4660_v55, %v2385_v43 }
 0x458   : > { %2411 = vst.msk [vmem:[%s4730_s12 + $0x60] sm:$0xff] %vm710_vm1, %v2403_v40 }
 0x459   : > { %v2383_v39 = vpop.permute.xlu1 %2382 }
 0x45a   : > { %v2402_v60 = vsel %vm2396_vm2, %v4678_v54, %v2383_v39  ;;  %v2635_v54 = vadd.f32 %v4696_v18, %v2517_v1 }
 0x45b   : > { %2410 = vst.msk [vmem:[%s4730_s12 + $0x48] sm:$0xff] %vm710_vm1, %v2402_v60 }
 0x45d   : > { %v2387_v22 = vpop.permute.xlu1 %2386 }
 0x45e   : > { %v2404_v4 = vsel %vm2396_vm2, %v4653_v36, %v2387_v22  ;;  %v2645_v36 = vadd.f32 %v4703_v48, %v2521_v59 }
 0x45f   : > { %2412 = vst.msk [vmem:[%s4730_s12 + $0x68] sm:$0xff] %vm710_vm1, %v2404_v4 }
 0x47e   : > { %v2950_v41 = vpop.permute.xlu1 %2949 }
 0x47f   : > { %v2972_v55 = vsel %vm2396_vm2, %v2625_v19, %v2950_v41 }
 0x480   : > { %3250 = vst.msk [vmem:[%s4730_s12 + $0x18] sm:$0xff] %vm710_vm1, %v2972_v55 }
 0x482   : > { %v2954_v47 = vpop.permute.xlu1 %2953 }
 0x483   : > { %v2974_v62 = vsel %vm2396_vm2, %v2635_v54, %v2954_v47 }
 0x484   : > { %3252 = vst.msk [vmem:[%s4730_s12 + $0x38] sm:$0xff] %vm710_vm1, %v2974_v62 }
 0x486   : > { %v2958_v53 = vpop.permute.xlu1 %2957 }
 0x487   : > { %v2976_v21 = vsel %vm2396_vm2, %v2645_v36, %v2958_v53 }
 0x488   : > { %3254 = vst.msk [vmem:[%s4730_s12 + $0x58] sm:$0xff] %vm710_vm1, %v2976_v21 }
 0x489   : > { %v2948_v14 = vpop.permute.xlu0 %2947 }
 0x48a   : > { %v2971_v18 = vsel %vm2396_vm2, %v2620_v37, %v2948_v14  ;;  %v2962_v20 = vpop.permute.xlu1 %2961 }
 0x48b   : > { %3249 = vst.msk [vmem:[%s4730_s12 + $0x10] sm:$0xff] %vm710_vm1, %v2971_v18  ;;  %v2978_v61 = vsel %vm2396_vm2, %v2655_v15, %v2962_v20 }
 0x48c   : > { %3256 = vst.msk [vmem:[%s4730_s12 + $0x78] sm:$0xff] %vm710_vm1, %v2978_v61 }
 0x48d   : > { %v2952_v32 = vpop.permute.xlu0 %2951 }
 0x48e   : > { %v2973_v48 = vsel %vm2396_vm2, %v2630_v38, %v2952_v32 }
 0x48f   : > { %3251 = vst.msk [vmem:[%s4730_s12 + $0x30] sm:$0xff] %vm710_vm1, %v2973_v48 }
 0x491   : > { %v2956_v46 = vpop.permute.xlu0 %2955 }
 0x492   : > { %v2975_v34 = vsel %vm2396_vm2, %v2640_v11, %v2956_v46 }
 0x493   : > { %3253 = vst.msk [vmem:[%s4730_s12 + $0x50] sm:$0xff] %vm710_vm1, %v2975_v34 }
 0x495   : > { %v2960_v24 = vpop.permute.xlu0 %2959 }
 0x496   : > { %v2977_v27 = vsel %vm2396_vm2, %v2650_v13, %v2960_v24 }
 0x497   : > { %3255 = vst.msk [vmem:[%s4730_s12 + $0x70] sm:$0xff] %vm710_vm1, %v2977_v27 }
 0x498 PF: > { %s22_s21 = sadd.s32 1, %s3605_s21   ;;  %s4845_s17 = smov %s3597_s19 }
 0x499   : > { %p19_p10 = scmp.ge.s32.totalorder %s22_s21, 10   ;;  %s4846_s18 = smov %s3601_s20 }
 0x49a   : > { %s4847_s19 = smov %s4850_s23  ;;  %s4848_s20 = smov %s4854_s24 }
 0x49b   :  { %21 = sbr.rel (!%p19_p10) target bundleno = 3 (0x3), region = 106 }
 0x4a2   :  { %3020 = vsyncpa [#allocation3], 1 }
 0x4a3   :  { %3022 = vsyncpa [#allocation3 + $0x1], 1 }

</bundles_post_ra>
